<compile_context>
chip_gen: v5e
topology: v5e:2x2
jax: 0.10.0
libtpu: 0.0.40
codegen_flags: <defaults>
</compile_context>

<pallas_src>
import functools

import jax
import jax.numpy as jnp
from jax.experimental import pallas as pl
from jax.experimental.pallas import tpu as pltpu

IN_FEATURES = 28 * 28          # 784
IN_PAD = 896                   # 7 * 128, lane-aligned K for the first matmul
HIDDEN = 512
OUT_FEATURES = 10
OUT_PAD = 128                  # lane-dense output width (sliced to 10 outside)
TB_MAX = 512                   # batch-tile rows (safe for v5e 16 MiB scoped VMEM)


def _round_up(x, m):
    return (x + m - 1) // m * m


def mlp_kernel(x_ref, w1_ref, b1_ref, w2_ref, b2_ref, w3_ref, b3_ref, out_ref):
    # Fused 3-layer MLP on one (TB, 896) batch tile. Weights are bf16 and
    # VMEM-resident across the whole grid; all dots accumulate in f32 on the
    # MXU; bias-add / ReLU stay in f32 on the VPU.
    x = x_ref[...].astype(jnp.bfloat16)
    h1 = jnp.dot(x, w1_ref[...], preferred_element_type=jnp.float32) + b1_ref[...]
    h1 = jnp.maximum(h1, 0.0).astype(jnp.bfloat16)
    h2 = jnp.dot(h1, w2_ref[...], preferred_element_type=jnp.float32) + b2_ref[...]
    h2 = jnp.maximum(h2, 0.0).astype(jnp.bfloat16)
    logits = jnp.dot(h2, w3_ref[...], preferred_element_type=jnp.float32) + b3_ref[...]
    out_ref[...] = logits.astype(out_ref.dtype)


def _prepare_padded_params(params):
    """Pad to lane-aligned shapes and cast weights to bf16 (biases stay f32)."""
    w1, b1, w2, b2, w3, b3 = params
    w1p = jnp.pad(w1, ((0, IN_PAD - w1.shape[0]), (0, 0))).astype(jnp.bfloat16)
    w2p = w2.astype(jnp.bfloat16)
    w3p = jnp.pad(w3, ((0, 0), (0, OUT_PAD - w3.shape[1]))).astype(jnp.bfloat16)
    b1p = b1.astype(jnp.float32)
    b2p = b2.astype(jnp.float32)
    b3p = jnp.pad(b3, ((0, 0), (0, OUT_PAD - b3.shape[1]))).astype(jnp.float32)
    return w1p, b1p, w2p, b2p, w3p, b3p


@functools.partial(jax.jit, static_argnames=())
def neural_network_forward(x_nchw, params):
    """x_nchw: (B, 1, 28, 28) float32. Returns logits (B, 10) float32."""
    w1p, b1p, w2p, b2p, w3p, b3p = _prepare_padded_params(params)

    B = x_nchw.shape[0]
    x_flat = x_nchw.reshape(B, IN_FEATURES).astype(jnp.float32)   # nn.Flatten
    x_flat = jnp.pad(x_flat, ((0, 0), (0, IN_PAD - IN_FEATURES)))  # K -> 896

    # Batch tile: multiple of 8 (sublane), capped at TB_MAX; pad B up to a
    # whole number of tiles so every block is full (no OOB reads/writes).
    tb = min(TB_MAX, _round_up(B, 8))
    b_pad = _round_up(B, tb)
    if b_pad != B:
        x_flat = jnp.pad(x_flat, ((0, b_pad - B), (0, 0)))

    grid = (b_pad // tb,)

    x_spec = pl.BlockSpec((tb, IN_PAD), lambda i: (i, 0))
    out_spec = pl.BlockSpec((tb, OUT_PAD), lambda i: (i, 0))
    # Weights/biases: full-array blocks with a constant index_map -> DMA'd once
    # and kept resident in VMEM across all batch tiles.
    w1_spec = pl.BlockSpec((IN_PAD, HIDDEN), lambda i: (0, 0))
    b1_spec = pl.BlockSpec((1, HIDDEN), lambda i: (0, 0))
    w2_spec = pl.BlockSpec((HIDDEN, HIDDEN), lambda i: (0, 0))
    b2_spec = pl.BlockSpec((1, HIDDEN), lambda i: (0, 0))
    w3_spec = pl.BlockSpec((HIDDEN, OUT_PAD), lambda i: (0, 0))
    b3_spec = pl.BlockSpec((1, OUT_PAD), lambda i: (0, 0))

    out_padded = pl.pallas_call(
        mlp_kernel,
        out_shape=jax.ShapeDtypeStruct((b_pad, OUT_PAD), jnp.float32),
        grid_spec=pltpu.PrefetchScalarGridSpec(
            num_scalar_prefetch=0,
            grid=grid,
            in_specs=[x_spec, w1_spec, b1_spec, w2_spec, b2_spec, w3_spec, b3_spec],
            out_specs=out_spec,
        ),
        compiler_params=pltpu.CompilerParams(
            dimension_semantics=("parallel",),
        ),
    )(x_flat, w1p, b1p, w2p, b2p, w3p, b3p)

    return out_padded[:B, :OUT_FEATURES]


def init_params(key):
    """PyTorch-style default init (uniform +/- 1/sqrt(fan_in)), deterministic."""
    def linear(key, fan_in, fan_out):
        kw, kb = jax.random.split(key)
        bound = 1.0 / jnp.sqrt(jnp.float32(fan_in))
        w = jax.random.uniform(kw, (fan_in, fan_out), jnp.float32, -bound, bound)
        b = jax.random.uniform(kb, (1, fan_out), jnp.float32, -bound, bound)
        return w, b

    k1, k2, k3 = jax.random.split(key, 3)
    w1, b1 = linear(k1, IN_FEATURES, HIDDEN)
    w2, b2 = linear(k2, HIDDEN, HIDDEN)
    w3, b3 = linear(k3, HIDDEN, OUT_FEATURES)
    return (w1, b1, w2, b2, w3, b3)


def reference_forward_bf16(x_nchw, params):
    """Pure-JAX reference that mirrors the kernel's bf16-operand / f32-accum math."""
    w1, b1, w2, b2, w3, b3 = params
    x = x_nchw.reshape(x_nchw.shape[0], -1).astype(jnp.bfloat16)
    h1 = jnp.dot(x, w1.astype(jnp.bfloat16), preferred_element_type=jnp.float32) + b1
    h1 = jnp.maximum(h1, 0.0).astype(jnp.bfloat16)
    h2 = jnp.dot(h1, w2.astype(jnp.bfloat16), preferred_element_type=jnp.float32) + b2
    h2 = jnp.maximum(h2, 0.0).astype(jnp.bfloat16)
    return jnp.dot(h2, w3.astype(jnp.bfloat16), preferred_element_type=jnp.float32) + b3


def reference_forward_f32(x_nchw, params):
    """Full-precision reference of the original PyTorch module."""
    w1, b1, w2, b2, w3, b3 = params
    x = x_nchw.reshape(x_nchw.shape[0], -1)
    h1 = jnp.maximum(x @ w1 + b1, 0.0)
    h2 = jnp.maximum(h1 @ w2 + b2, 0.0)
    return h2 @ w3 + b3


if __name__ == "__main__":
    key = jax.random.PRNGKey(0)
    k_params, k_x = jax.random.split(key)

    params = init_params(k_params)
    x = jax.random.normal(k_x, (2, 1, 28, 28), dtype=jnp.float32)  # NCHW, like PyTorch

    logits = jax.block_until_ready(neural_network_forward(x, params))
    assert logits.shape == (2, OUT_FEATURES), logits.shape

    # Match against a bf16-operand reference (tight tolerance) ...
    ref_bf16 = reference_forward_bf16(x, params)
    assert jnp.allclose(logits, ref_bf16, atol=2e-3, rtol=2e-3), "mismatch vs bf16 reference"
    # ... and sanity-check against the full f32 reference (bf16 rounding tolerance).
    ref_f32 = reference_forward_f32(x, params)
    assert jnp.allclose(logits, ref_f32, atol=5e-2, rtol=5e-2), "mismatch vs f32 reference"

    print("KERNEL_OK")
</pallas_src>

<mosaic_0001>
module attributes {stable_mosaic.version = 11 : i64} {
  func.func @mlp_kernel(%arg0: i32, %arg1: memref<8x896xf32, #tpu.memory_space<vmem>>, %arg2: memref<896x512xbf16, #tpu.memory_space<vmem>>, %arg3: memref<1x512xf32, #tpu.memory_space<vmem>>, %arg4: memref<512x512xbf16, #tpu.memory_space<vmem>>, %arg5: memref<1x512xf32, #tpu.memory_space<vmem>>, %arg6: memref<512x128xbf16, #tpu.memory_space<vmem>>, %arg7: memref<1x128xf32, #tpu.memory_space<vmem>>, %arg8: memref<8x128xf32, #tpu.memory_space<vmem>>) attributes {dimension_semantics = [#tpu.dimension_semantics<parallel>], iteration_bounds = array<i64: 1>, scalar_prefetch = 0 : i64, scratch_operands = 0 : i64, tpu.core_type = #tpu.core_type<tc>, window_params = [{transform_indices = @transform_0, window_bounds = array<i64: 8, 896>}, {pipeline_mode = #tpu.pipeline_mode<synchronous>, transform_indices = @transform_1, window_bounds = array<i64: 896, 512>}, {pipeline_mode = #tpu.pipeline_mode<synchronous>, transform_indices = @transform_2, window_bounds = array<i64: 1, 512>}, {pipeline_mode = #tpu.pipeline_mode<synchronous>, transform_indices = @transform_3, window_bounds = array<i64: 512, 512>}, {pipeline_mode = #tpu.pipeline_mode<synchronous>, transform_indices = @transform_4, window_bounds = array<i64: 1, 512>}, {pipeline_mode = #tpu.pipeline_mode<synchronous>, transform_indices = @transform_5, window_bounds = array<i64: 512, 128>}, {pipeline_mode = #tpu.pipeline_mode<synchronous>, transform_indices = @transform_6, window_bounds = array<i64: 1, 128>}, {transform_indices = @transform_7, window_bounds = array<i64: 8, 128>}]} {
    %c0 = arith.constant 0 : index
    %c0_0 = arith.constant 0 : index
    %0 = vector.load %arg1[%c0, %c0_0] : memref<8x896xf32, #tpu.memory_space<vmem>>, vector<8x896xf32>
    %1 = arith.truncf %0 : vector<8x896xf32> to vector<8x896xbf16>
    %c0_1 = arith.constant 0 : index
    %c0_2 = arith.constant 0 : index
    %2 = vector.load %arg2[%c0_1, %c0_2] : memref<896x512xbf16, #tpu.memory_space<vmem>>, vector<896x512xbf16>
    %cst = arith.constant dense<0.000000e+00> : vector<8x512xf32>
    %3 = tpu.matmul %1, %2, %cst {dimension_numbers = #tpu.dot_dimension_numbers<[1], [0], [0], [1], [0, 0, 1, 1], [], []>} : vector<8x896xbf16>, vector<896x512xbf16>, vector<8x512xf32> -> vector<8x512xf32>
    %c0_3 = arith.constant 0 : index
    %c0_4 = arith.constant 0 : index
    %4 = vector.load %arg3[%c0_3, %c0_4] : memref<1x512xf32, #tpu.memory_space<vmem>>, vector<1x512xf32>
    %5 = vector.broadcast %4 : vector<1x512xf32> to vector<8x512xf32>
    %6 = arith.addf %3, %5 : vector<8x512xf32>
    %cst_5 = arith.constant 0.000000e+00 : f32
    %7 = vector.broadcast %cst_5 : f32 to vector<8x512xf32>
    %8 = arith.maximumf %6, %7 : vector<8x512xf32>
    %9 = arith.truncf %8 : vector<8x512xf32> to vector<8x512xbf16>
    %c0_6 = arith.constant 0 : index
    %c0_7 = arith.constant 0 : index
    %10 = vector.load %arg4[%c0_6, %c0_7] : memref<512x512xbf16, #tpu.memory_space<vmem>>, vector<512x512xbf16>
    %cst_8 = arith.constant dense<0.000000e+00> : vector<8x512xf32>
    %11 = tpu.matmul %9, %10, %cst_8 {dimension_numbers = #tpu.dot_dimension_numbers<[1], [0], [0], [1], [0, 0, 1, 1], [], []>} : vector<8x512xbf16>, vector<512x512xbf16>, vector<8x512xf32> -> vector<8x512xf32>
    %c0_9 = arith.constant 0 : index
    %c0_10 = arith.constant 0 : index
    %12 = vector.load %arg5[%c0_9, %c0_10] : memref<1x512xf32, #tpu.memory_space<vmem>>, vector<1x512xf32>
    %13 = vector.broadcast %12 : vector<1x512xf32> to vector<8x512xf32>
    %14 = arith.addf %11, %13 : vector<8x512xf32>
    %cst_11 = arith.constant 0.000000e+00 : f32
    %15 = vector.broadcast %cst_11 : f32 to vector<8x512xf32>
    %16 = arith.maximumf %14, %15 : vector<8x512xf32>
    %17 = arith.truncf %16 : vector<8x512xf32> to vector<8x512xbf16>
    %c0_12 = arith.constant 0 : index
    %c0_13 = arith.constant 0 : index
    %18 = vector.load %arg6[%c0_12, %c0_13] : memref<512x128xbf16, #tpu.memory_space<vmem>>, vector<512x128xbf16>
    %cst_14 = arith.constant dense<0.000000e+00> : vector<8x128xf32>
    %19 = tpu.matmul %17, %18, %cst_14 {dimension_numbers = #tpu.dot_dimension_numbers<[1], [0], [0], [1], [0, 0, 1, 1], [], []>} : vector<8x512xbf16>, vector<512x128xbf16>, vector<8x128xf32> -> vector<8x128xf32>
    %c0_15 = arith.constant 0 : index
    %c0_16 = arith.constant 0 : index
    %20 = vector.load %arg7[%c0_15, %c0_16] : memref<1x128xf32, #tpu.memory_space<vmem>>, vector<1x128xf32>
    %21 = vector.broadcast %20 : vector<1x128xf32> to vector<8x128xf32>
    %22 = arith.addf %19, %21 : vector<8x128xf32>
    %c0_17 = arith.constant 0 : index
    %c0_18 = arith.constant 0 : index
    %23 = vector.load %arg8[%c0_17, %c0_18] : memref<8x128xf32, #tpu.memory_space<vmem>>, vector<8x128xf32>
    tpu.vector_store %arg8[%c0_17, %c0_18], %22 {strides = array<i32>} : memref<8x128xf32, #tpu.memory_space<vmem>>, vector<8x128xf32>,
    return
  }
  func.func @transform_0(%arg0: i32) -> (i32, i32) {
    %c0_i32 = arith.constant 0 : i32
    %c0_i32_0 = arith.constant 0 : i32
    return %arg0, %c0_i32 : i32, i32
  }
  func.func @transform_1(%arg0: i32) -> (i32, i32) {
    %c0_i32 = arith.constant 0 : i32
    %c0_i32_0 = arith.constant 0 : i32
    %c0_i32_1 = arith.constant 0 : i32
    return %c0_i32, %c0_i32_0 : i32, i32
  }
  func.func @transform_2(%arg0: i32) -> (i32, i32) {
    %c0_i32 = arith.constant 0 : i32
    %c0_i32_0 = arith.constant 0 : i32
    %c0_i32_1 = arith.constant 0 : i32
    return %c0_i32, %c0_i32_0 : i32, i32
  }
  func.func @transform_3(%arg0: i32) -> (i32, i32) {
    %c0_i32 = arith.constant 0 : i32
    %c0_i32_0 = arith.constant 0 : i32
    %c0_i32_1 = arith.constant 0 : i32
    return %c0_i32, %c0_i32_0 : i32, i32
  }
  func.func @transform_4(%arg0: i32) -> (i32, i32) {
    %c0_i32 = arith.constant 0 : i32
    %c0_i32_0 = arith.constant 0 : i32
    %c0_i32_1 = arith.constant 0 : i32
    return %c0_i32, %c0_i32_0 : i32, i32
  }
  func.func @transform_5(%arg0: i32) -> (i32, i32) {
    %c0_i32 = arith.constant 0 : i32
    %c0_i32_0 = arith.constant 0 : i32
    %c0_i32_1 = arith.constant 0 : i32
    return %c0_i32, %c0_i32_0 : i32, i32
  }
  func.func @transform_6(%arg0: i32) -> (i32, i32) {
    %c0_i32 = arith.constant 0 : i32
    %c0_i32_0 = arith.constant 0 : i32
    %c0_i32_1 = arith.constant 0 : i32
    return %c0_i32, %c0_i32_0 : i32, i32
  }
  func.func @transform_7(%arg0: i32) -> (i32, i32) {
    %c0_i32 = arith.constant 0 : i32
    %c0_i32_0 = arith.constant 0 : i32
    return %arg0, %c0_i32 : i32, i32
  }
}

</mosaic_0001>

<bundles_post_ra>
// kernel: neural_network_forward.1
= control target key start
LH: loop header
LB: loop body
LE: loop exit
PB: predicated region body
PF: predicated region fallthrough
CT: control target
= control target key end

     0   :  { %s7426_s1 = inlined_call_operand.vmem [shape: bf16[896,512], index: 1, kind: input, shape index: {}]   ;;  %s7427_s0 = inlined_call_operand.vmem [shape: f32[8,896], index: 0, kind: input, shape index: {}]   ;;  %s7428_s2 = inlined_call_operand.vmem [shape: f32[1,512], index: 2, kind: input, shape index: {}]   ;;  %s7429_s3 = inlined_call_operand.vmem [shape: bf16[512,512], index: 3, kind: input, shape index: {}]   ;;  %s7430_s4 = inlined_call_operand.vmem [shape: f32[1,512], index: 4, kind: input, shape index: {}]   ;;  %s7431_s5 = inlined_call_operand.vmem [shape: bf16[512,128], index: 5, kind: input, shape index: {}]   ;;  %s7432_s6 = inlined_call_operand.vmem [shape: f32[1,128], index: 6, kind: input, shape index: {}]   ;;  %s7433_s7 = inlined_call_operand.vmem [shape: f32[8,128], index: 7, kind: output, shape index: {}]  }
   0x1   :  { %v3191_v0 = vld [vmem:[%s7426_s1 + $0xe0] sm:$0xf]  ;;  %v4643_v1 = vld [vmem:[%s7426_s1 + $0xec] sm:$0xf0] }
   0x2   :  { %v3319_v2 = vld [vmem:[%s7426_s1 + $0x1e0] sm:$0xf]  ;;  %v3192_v3 = vor.u32 %v4643_v1, %v3191_v0  ;;  %v4675_v4 = vld [vmem:[%s7426_s1 + $0x1ec] sm:$0xf0] }
   0x3   :  { %v3447_v5 = vld [vmem:[%s7426_s1 + $0x2e0] sm:$0xf]  ;;  %v4707_v6 = vld [vmem:[%s7426_s1 + $0x2ec] sm:$0xf0]  ;;  %v3320_v7 = vor.u32 %v4675_v4, %v3319_v2 }
   0x4   :  { %v3448_v8 = vor.u32 %v4707_v6, %v3447_v5  ;;  %v3575_v9 = vld [vmem:[%s7426_s1 + $0x3e0] sm:$0xf]  ;;  %v4739_v10 = vld [vmem:[%s7426_s1 + $0x3ec] sm:$0xf0]  ;;  %1394 = vmatpush.bf16.msra.mxu0 %v3192_v3 }
   0x5   :  { %v3175_v11 = vld [vmem:[%s7426_s1 + $0xc0] sm:$0xf]  ;;  %v3576_v12 = vor.u32 %v4739_v10, %v3575_v9  ;;  %v4639_v13 = vld [vmem:[%s7426_s1 + $0xcc] sm:$0xf0]  ;;  %1407 = vmatpush.bf16.msra.mxu1 %v3320_v7 }
   0x6   :  { %v3303_v14 = vld [vmem:[%s7426_s1 + $0x1c0] sm:$0xf]  ;;  %v4671_v15 = vld [vmem:[%s7426_s1 + $0x1cc] sm:$0xf0]  ;;  %1420 = vmatpush.bf16.msra.mxu2 %v3448_v8  ;;  %v3176_v16 = vor.u32 %v4639_v13, %v3175_v11 }
   0x7   :  { %v3304_v17 = vor.u32 %v4671_v15, %v3303_v14  ;;  %v3431_v18 = vld [vmem:[%s7426_s1 + $0x2c0] sm:$0xf]  ;;  %v4703_v19 = vld [vmem:[%s7426_s1 + $0x2cc] sm:$0xf0]  ;;  %1433 = vmatpush.bf16.msra.mxu3 %v3576_v12 }
   0x8   :  { %v3559_v20 = vld [vmem:[%s7426_s1 + $0x3c0] sm:$0xf]  ;;  %v3432_v21 = vor.u32 %v4703_v19, %v3431_v18  ;;  %v4735_v22 = vld [vmem:[%s7426_s1 + $0x3cc] sm:$0xf0]  ;;  %1395 = vmatpush.bf16.msra.mxu0 %v3176_v16 }
   0x9   :  { %v3159_v23 = vld [vmem:[%s7426_s1 + $0xa0] sm:$0xf]  ;;  %v4635_v24 = vld [vmem:[%s7426_s1 + $0xac] sm:$0xf0]  ;;  %v3560_v25 = vor.u32 %v4735_v22, %v3559_v20  ;;  %1408 = vmatpush.bf16.msra.mxu1 %v3304_v17 }
   0xa   :  { %v3287_v26 = vld [vmem:[%s7426_s1 + $0x1a0] sm:$0xf]  ;;  %v4667_v27 = vld [vmem:[%s7426_s1 + $0x1ac] sm:$0xf0]  ;;  %v3160_v29 = vor.u32 %v4635_v24, %v3159_v23  ;;  %1421 = vmatpush.bf16.msra.mxu2 %v3432_v21 }
   0xb   :  { %v3415_v28 = vld [vmem:[%s7426_s1 + $0x2a0] sm:$0xf]  ;;  %v4699_v30 = vld [vmem:[%s7426_s1 + $0x2ac] sm:$0xf0]  ;;  %v3288_v33 = vor.u32 %v4667_v27, %v3287_v26  ;;  %1434 = vmatpush.bf16.msra.mxu3 %v3560_v25 }
   0xc   :  { %v3543_v31 = vld [vmem:[%s7426_s1 + $0x3a0] sm:$0xf]  ;;  %v4731_v32 = vld [vmem:[%s7426_s1 + $0x3ac] sm:$0xf0]  ;;  %v3416_v34 = vor.u32 %v4699_v30, %v3415_v28  ;;  %1396 = vmatpush.bf16.msra.mxu0 %v3160_v29 }
   0xd   :  { %v3143_v35 = vld [vmem:[%s7426_s1 + $0x80] sm:$0xf]  ;;  %v4631_v36 = vld [vmem:[%s7426_s1 + $0x8c] sm:$0xf0]  ;;  %v3544_v38 = vor.u32 %v4731_v32, %v3543_v31  ;;  %1409 = vmatpush.bf16.msra.mxu1 %v3288_v33 }
   0xe   :  { %v3271_v37 = vld [vmem:[%s7426_s1 + $0x180] sm:$0xf]  ;;  %v4663_v39 = vld [vmem:[%s7426_s1 + $0x18c] sm:$0xf0]  ;;  %v3144_v44 = vor.u32 %v4631_v36, %v3143_v35  ;;  %1422 = vmatpush.bf16.msra.mxu2 %v3416_v34 }
   0xf   :  { %v3399_v40 = vld [vmem:[%s7426_s1 + $0x280] sm:$0xf]  ;;  %v4695_v41 = vld [vmem:[%s7426_s1 + $0x28c] sm:$0xf0]  ;;  %v3272_v45 = vor.u32 %v4663_v39, %v3271_v37  ;;  %1435 = vmatpush.bf16.msra.mxu3 %v3544_v38  ;;  %v4641_v37 = vld [vmem:[%s7426_s1 + $0xe4] sm:$0xf] }
  0x10   :  { %v3527_v42 = vld [vmem:[%s7426_s1 + $0x380] sm:$0xf]  ;;  %v4727_v43 = vld [vmem:[%s7426_s1 + $0x38c] sm:$0xf0]  ;;  %v3400_v46 = vor.u32 %v4695_v41, %v3399_v40  ;;  %1397 = vmatpush.bf16.msra.mxu0 %v3144_v44  ;;  %v3193_v38 = vld [vmem:[%s7426_s1 + $0xf0] sm:$0xf0] }
  0x11   :  { %v3127_v47 = vld [vmem:[%s7426_s1 + $0x60] sm:$0xf]  ;;  %v4627_v48 = vld [vmem:[%s7426_s1 + $0x6c] sm:$0xf0]  ;;  %v3528_v50 = vor.u32 %v4727_v43, %v3527_v42  ;;  %1410 = vmatpush.bf16.msra.mxu1 %v3272_v45 }
  0x12   :  { %v3255_v49 = vld [vmem:[%s7426_s1 + $0x160] sm:$0xf]  ;;  %v4659_v51 = vld [vmem:[%s7426_s1 + $0x16c] sm:$0xf0]  ;;  %v3128_v56 = vor.u32 %v4627_v48, %v3127_v47  ;;  %1423 = vmatpush.bf16.msra.mxu2 %v3400_v46  ;;  %v3196_v46 = vor.u32 %v4641_v37, %v3193_v38 }
  0x13   :  { %v3383_v52 = vld [vmem:[%s7426_s1 + $0x260] sm:$0xf]  ;;  %v4691_v53 = vld [vmem:[%s7426_s1 + $0x26c] sm:$0xf0]  ;;  %v3256_v57 = vor.u32 %v4659_v51, %v3255_v49  ;;  %1436 = vmatpush.bf16.msra.mxu3 %v3528_v50  ;;  %v4637_v50 = vld [vmem:[%s7426_s1 + $0xc4] sm:$0xf] }
  0x14   :  { %v3511_v54 = vld [vmem:[%s7426_s1 + $0x360] sm:$0xf]  ;;  %v4723_v55 = vld [vmem:[%s7426_s1 + $0x36c] sm:$0xf0]  ;;  %v3384_v58 = vor.u32 %v4691_v53, %v3383_v52  ;;  %1398 = vmatpush.bf16.msra.mxu0 %v3128_v56  ;;  %v3177_v51 = vld [vmem:[%s7426_s1 + $0xd0] sm:$0xf0] }
  0x15   :  { %v3111_v59 = vld [vmem:[%s7426_s1 + $0x40] sm:$0xf]  ;;  %v4623_v60 = vld [vmem:[%s7426_s1 + $0x4c] sm:$0xf0]  ;;  %v3512_v62 = vor.u32 %v4723_v55, %v3511_v54  ;;  %1411 = vmatpush.bf16.msra.mxu1 %v3256_v57 }
  0x16   :  { %v3239_v61 = vld [vmem:[%s7426_s1 + $0x140] sm:$0xf]  ;;  %v4655_v63 = vld [vmem:[%s7426_s1 + $0x14c] sm:$0xf0]  ;;  %v3112_v4 = vor.u32 %v4623_v60, %v3111_v59  ;;  %1424 = vmatpush.bf16.msra.mxu2 %v3384_v58  ;;  %v3180_v59 = vor.u32 %v4637_v50, %v3177_v51 }
  0x17   :  { %v3367_v0 = vld [vmem:[%s7426_s1 + $0x240] sm:$0xf]  ;;  %v4687_v1 = vld [vmem:[%s7426_s1 + $0x24c] sm:$0xf0]  ;;  %v3240_v5 = vor.u32 %v4655_v63, %v3239_v61  ;;  %1437 = vmatpush.bf16.msra.mxu3 %v3512_v62  ;;  %v4633_v62 = vld [vmem:[%s7426_s1 + $0xa4] sm:$0xf] }
  0x18   :  { %v3495_v2 = vld [vmem:[%s7426_s1 + $0x340] sm:$0xf]  ;;  %v4719_v3 = vld [vmem:[%s7426_s1 + $0x34c] sm:$0xf0]  ;;  %v3368_v6 = vor.u32 %v4687_v1, %v3367_v0  ;;  %1399 = vmatpush.bf16.msra.mxu0 %v3112_v4  ;;  %v3161_v63 = vld [vmem:[%s7426_s1 + $0xb0] sm:$0xf0] }
  0x19   :  { %v3095_v7 = vld [vmem:[%s7426_s1 + $0x20] sm:$0xf]  ;;  %v4619_v8 = vld [vmem:[%s7426_s1 + $0x2c] sm:$0xf0]  ;;  %v3496_v10 = vor.u32 %v4719_v3, %v3495_v2  ;;  %1412 = vmatpush.bf16.msra.mxu1 %v3240_v5 }
  0x1a   :  { %v3223_v9 = vld [vmem:[%s7426_s1 + $0x120] sm:$0xf]  ;;  %v4651_v11 = vld [vmem:[%s7426_s1 + $0x12c] sm:$0xf0]  ;;  %v3096_v16 = vor.u32 %v4619_v8, %v3095_v7  ;;  %1425 = vmatpush.bf16.msra.mxu2 %v3368_v6 }
  0x1b   :  { %v3351_v12 = vld [vmem:[%s7426_s1 + $0x220] sm:$0xf]  ;;  %v4683_v13 = vld [vmem:[%s7426_s1 + $0x22c] sm:$0xf0]  ;;  %v3224_v19 = vor.u32 %v4651_v11, %v3223_v9  ;;  %1438 = vmatpush.bf16.msra.mxu3 %v3496_v10  ;;  %v29_v10 = vld [vmem:[%s7427_s0 + $0x18] sm:$0xff]  ;;  %v3164_v11 = vor.u32 %v4633_v62, %v3161_v63 }
  0x1c   :  { %v3479_v14 = vld [vmem:[%s7426_s1 + $0x320] sm:$0xf]  ;;  %v4715_v15 = vld [vmem:[%s7426_s1 + $0x32c] sm:$0xf0]  ;;  %v3352_v20 = vor.u32 %v4683_v13, %v3351_v12  ;;  %1400 = vmatpush.bf16.msra.mxu0 %v3096_v16  ;;  %v4629_v16 = vld [vmem:[%s7426_s1 + $0x84] sm:$0xf] }
  0x1d   :  { %v3079_v17 = vld [vmem:[%s7426_s1] sm:$0xf]  ;;  %v4615_v18 = vld [vmem:[%s7426_s1 + $0xc] sm:$0xf0]  ;;  %v3480_v24 = vor.u32 %v4715_v15, %v3479_v14  ;;  %1413 = vmatpush.bf16.msra.mxu1 %v3224_v19  ;;  %v5334_v15 = vpack.c.bf16 %v29_v10, %v29_v10  ;;  %v27_v19 = vld [vmem:[%s7427_s0 + $0x8] sm:$0xff] }
  0x1e   :  { %v3207_v21 = vld [vmem:[%s7426_s1 + $0x100] sm:$0xf]  ;;  %v4647_v22 = vld [vmem:[%s7426_s1 + $0x10c] sm:$0xf0]  ;;  %v3080_v31 = vor.u32 %v4615_v18, %v3079_v17  ;;  %1426 = vmatpush.bf16.msra.mxu2 %v3352_v20  ;;  %v3145_v17 = vld [vmem:[%s7426_s1 + $0x90] sm:$0xf0] }
  0x1f   :  { %v3335_v23 = vld [vmem:[%s7426_s1 + $0x200] sm:$0xf]  ;;  %v4679_v25 = vld [vmem:[%s7426_s1 + $0x20c] sm:$0xf0]  ;;  %v3208_v35 = vor.u32 %v4647_v22, %v3207_v21  ;;  %1439 = vmatpush.bf16.msra.mxu3 %v3480_v24  ;;  %v3449_v10 = vld [vmem:[%s7426_s1 + $0x2f0] sm:$0xf0] }
  0x20   :  { %v3463_v26 = vld [vmem:[%s7426_s1 + $0x300] sm:$0xf]  ;;  %v4711_v27 = vld [vmem:[%s7426_s1 + $0x30c] sm:$0xf0]  ;;  %v3336_v36 = vor.u32 %v4679_v25, %v3335_v23  ;;  %1401 = vmatpush.bf16.msra.mxu0 %v3080_v31  ;;  %v5357_v25 = vpack.c.bf16 %v27_v19, %v27_v19  ;;  %v3129_v31 = vld [vmem:[%s7426_s1 + $0x70] sm:$0xf0] }
  0x21   :  { %v3703_v28 = vld [vmem:[%s7426_s1 + $0x4e0] sm:$0xf]  ;;  %v4771_v29 = vld [vmem:[%s7426_s1 + $0x4ec] sm:$0xf0]  ;;  %v3464_v39 = vor.u32 %v4711_v27, %v3463_v26  ;;  %1414 = vmatpush.bf16.msra.mxu1 %v3208_v35  ;;  %v3148_v26 = vor.u32 %v4629_v16, %v3145_v17  ;;  %v4769_v16 = vld [vmem:[%s7426_s1 + $0x4e4] sm:$0xf] }
  0x22   :  { %v3831_v30 = vld [vmem:[%s7426_s1 + $0x5e0] sm:$0xf]  ;;  %v4803_v32 = vld [vmem:[%s7426_s1 + $0x5ec] sm:$0xf0]  ;;  %v3704_v40 = vor.u32 %v4771_v29, %v3703_v28  ;;  %1427 = vmatpush.bf16.msra.mxu2 %v3336_v36  ;;  %v3705_v17 = vld [vmem:[%s7426_s1 + $0x4f0] sm:$0xf0] }
  0x23   :  { %v3959_v33 = vld [vmem:[%s7426_s1 + $0x6e0] sm:$0xf]  ;;  %v4835_v34 = vld [vmem:[%s7426_s1 + $0x6ec] sm:$0xf0]  ;;  %v3832_v41 = vor.u32 %v4803_v32, %v3831_v30  ;;  %1440 = vmatpush.bf16.msra.mxu3 %v3464_v39  ;;  %v4625_v30 = vld [vmem:[%s7426_s1 + $0x64] sm:$0xf] }
  0x24   :  { %v3960_v42 = vor.u32 %v4835_v34, %v3959_v33  ;;  %v3687_v43 = vld [vmem:[%s7426_s1 + $0x4c0] sm:$0xf]  ;;  %v4767_v44 = vld [vmem:[%s7426_s1 + $0x4cc] sm:$0xf0]  ;;  %1446 = vmatpush.bf16.msrb.mxu0 %v3704_v40  ;;  %1415 = vmatmul.bf16.vlgmr.msra.gmra.mxu1 %v5357_v25  ;;  %v3132_v38 = vor.u32 %v4625_v30, %v3129_v31  ;;  %v3433_v30 = vld [vmem:[%s7426_s1 + $0x2d0] sm:$0xf0] }
  0x25   :  { %v3815_v45 = vld [vmem:[%s7426_s1 + $0x5c0] sm:$0xf]  ;;  %v4799_v47 = vld [vmem:[%s7426_s1 + $0x5cc] sm:$0xf0]  ;;  %v3688_v52 = vor.u32 %v4767_v44, %v3687_v43  ;;  %1459 = vmatpush.bf16.msrb.mxu1 %v3832_v41  ;;  %v3113_v43 = vld [vmem:[%s7426_s1 + $0x50] sm:$0xf0] }
  0x26   :  { %v3943_v48 = vld [vmem:[%s7426_s1 + $0x6c0] sm:$0xf]  ;;  %v4831_v49 = vld [vmem:[%s7426_s1 + $0x6cc] sm:$0xf0]  ;;  %1472 = vmatpush.bf16.msrb.mxu2 %v3960_v42  ;;  %v3816_v54 = vor.u32 %v4799_v47, %v3815_v45  ;;  %1441 = vmatmul.bf16.vlgmr.msra.gmra.mxu3 %v5334_v15  ;;  %v4621_v42 = vld [vmem:[%s7426_s1 + $0x44] sm:$0xf] }
  0x27   :  { %v3671_v53 = vld [vmem:[%s7426_s1 + $0x4a0] sm:$0xf]  ;;  %v3944_v55 = vor.u32 %v4831_v49, %v3943_v48  ;;  %v4763_v56 = vld [vmem:[%s7426_s1 + $0x4ac] sm:$0xf0]  ;;  %1485 = vmatpush.bf16.msrb.mxu3 %v3196_v46  ;;  %v3116_v50 = vor.u32 %v4621_v42, %v3113_v43  ;;  %v4733_v31 = vld [vmem:[%s7426_s1 + $0x3c4] sm:$0xf] }
  0x28   :  { %v3799_v57 = vld [vmem:[%s7426_s1 + $0x5a0] sm:$0xf]  ;;  %v4795_v58 = vld [vmem:[%s7426_s1 + $0x5ac] sm:$0xf0]  ;;  %1447 = vmatpush.bf16.msrb.mxu0 %v3688_v52  ;;  %v3672_v0 = vor.u32 %v4763_v56, %v3671_v53  ;;  %v3289_v42 = vld [vmem:[%s7426_s1 + $0x1b0] sm:$0xf0] }
  0x29   :  { %v3927_v60 = vld [vmem:[%s7426_s1 + $0x6a0] sm:$0xf]  ;;  %v4827_v61 = vld [vmem:[%s7426_s1 + $0x6ac] sm:$0xf0]  ;;  %v3800_v1 = vor.u32 %v4795_v58, %v3799_v57  ;;  %1460 = vmatpush.bf16.msrb.mxu1 %v3816_v54  ;;  %v4617_v54 = vld [vmem:[%s7426_s1 + $0x24] sm:$0xf] }
  0x2a   :  { %v3655_v2 = vld [vmem:[%s7426_s1 + $0x480] sm:$0xf]  ;;  %v28_v3 = vld [vmem:[%s7427_s0 + $0x10] sm:$0xff]  ;;  %1473 = vmatpush.bf16.msrb.mxu2 %v3944_v55  ;;  %v3928_v5 = vor.u32 %v4827_v61, %v3927_v60  ;;  %v4697_v43 = vld [vmem:[%s7426_s1 + $0x2a4] sm:$0xf] }
  0x2b   :  { %v26_v4 = vld [vmem:[%s7427_s0] sm:$0xff]  ;;  %v4759_v6 = vld [vmem:[%s7426_s1 + $0x48c] sm:$0xf0]  ;;  %v5318_v8 = vpack.c.bf16 %v28_v3, %v28_v3  ;;  %1486 = vmatpush.bf16.msrb.mxu3 %v3180_v59  ;;  %v3097_v55 = vld [vmem:[%s7426_s1 + $0x30] sm:$0xf0] }
  0x2c   :  { %v3783_v7 = vld [vmem:[%s7426_s1 + $0x580] sm:$0xf]  ;;  %v5320_v9 = vpack.c.bf16 %v26_v4, %v26_v4  ;;  %v4791_v12 = vld [vmem:[%s7426_s1 + $0x58c] sm:$0xf0]  ;;  %1448 = vmatpush.bf16.msrb.mxu0 %v3672_v0  ;;  %v3656_v18 = vor.u32 %v4759_v6, %v3655_v2  ;;  %v3100_v0 = vor.u32 %v4617_v54, %v3097_v55  ;;  %v4613_v2 = vld [vmem:[%s7426_s1 + $0x4] sm:$0xf] }
  0x2d   :  { %v3911_v13 = vld [vmem:[%s7426_s1 + $0x680] sm:$0xf]  ;;  %v4823_v14 = vld [vmem:[%s7426_s1 + $0x68c] sm:$0xf0]  ;;  %1428 = vmatmul.bf16.vlgmr.msra.gmra.mxu2 %v5318_v8  ;;  %1461 = vmatpush.bf16.msrb.mxu1 %v3800_v1  ;;  %v3784_v20 = vor.u32 %v4791_v12, %v3783_v7  ;;  %v3081_v3 = vld [vmem:[%s7426_s1 + $0x10] sm:$0xf0] }
  0x2e   :  { %1402 = vmatmul.bf16.vlgmr.msra.gmra.mxu0 %v5320_v9  ;;  %1474 = vmatpush.bf16.msrb.mxu2 %v3928_v5  ;;  %v3912_v21 = vor.u32 %v4823_v14, %v3911_v13  ;;  %v3639_v22 = vld [vmem:[%s7426_s1 + $0x460] sm:$0xf]  ;;  %v4755_v23 = vld [vmem:[%s7426_s1 + $0x46c] sm:$0xf0]  ;;  %v4673_v4 = vld [vmem:[%s7426_s1 + $0x1e4] sm:$0xf]  ;;  %v3084_v19 = vor.u32 %v4613_v2, %v3081_v3 }
  0x2f   :  { %v3767_v24 = vld [vmem:[%s7426_s1 + $0x560] sm:$0xf]  ;;  %1487 = vmatpush.bf16.msrb.mxu3 %v3164_v11  ;;  %v4787_v27 = vld [vmem:[%s7426_s1 + $0x56c] sm:$0xf0]  ;;  %v3640_v32 = vor.u32 %v4755_v23, %v3639_v22  ;;  %v3321_v5 = vld [vmem:[%s7426_s1 + $0x1f0] sm:$0xf0] }
  0x30   :  { %v3895_v28 = vld [vmem:[%s7426_s1 + $0x660] sm:$0xf]  ;;  %v4819_v29 = vld [vmem:[%s7426_s1 + $0x66c] sm:$0xf0]  ;;  %1449 = vmatpush.bf16.msrb.mxu0 %v3656_v18  ;;  %v3768_v33 = vor.u32 %v4787_v27, %v3767_v24  ;;  %v4705_v6 = vld [vmem:[%s7426_s1 + $0x2e4] sm:$0xf] }
  0x31   :  { %1462 = vmatpush.bf16.msrb.mxu1 %v3784_v20  ;;  %v3896_v34 = vor.u32 %v4819_v29, %v3895_v28  ;;  %v3623_v35 = vld [vmem:[%s7426_s1 + $0x440] sm:$0xf]  ;;  %v4751_v36 = vld [vmem:[%s7426_s1 + $0x44c] sm:$0xf0]  ;;  %v4737_v11 = vld [vmem:[%s7426_s1 + $0x3e4] sm:$0xf]  ;;  %v3324_v20 = vor.u32 %v4673_v4, %v3321_v5  ;;  %v3452_v23 = vor.u32 %v4705_v6, %v3449_v10  ;;  %v3708_v29 = vor.u32 %v4769_v16, %v3705_v17 }
  0x32   :  { %1475 = vmatpush.bf16.msrb.mxu2 %v3912_v21  ;;  %v3751_v37 = vld [vmem:[%s7426_s1 + $0x540] sm:$0xf]  ;;  %v4783_v39 = vld [vmem:[%s7426_s1 + $0x54c] sm:$0xf0]  ;;  %v3624_v44 = vor.u32 %v4751_v36, %v3623_v35  ;;  %v3577_v12 = vld [vmem:[%s7426_s1 + $0x3f0] sm:$0xf0] }
  0x33   :  { %1488 = vmatpush.bf16.msrb.mxu3 %v3148_v26  ;;  %v3879_v40 = vld [vmem:[%s7426_s1 + $0x640] sm:$0xf]  ;;  %v4815_v41 = vld [vmem:[%s7426_s1 + $0x64c] sm:$0xf0]  ;;  %v3752_v45 = vor.u32 %v4783_v39, %v3751_v37  ;;  %v31_v22 = vld [vmem:[%s7427_s0 + $0x28] sm:$0xff]  ;;  %v3580_v24 = vor.u32 %v4737_v11, %v3577_v12 }
  0x34   :  { %1450 = vmatpush.bf16.msrb.mxu0 %v3640_v32  ;;  %v3880_v46 = vor.u32 %v4815_v41, %v3879_v40  ;;  %v3607_v47 = vld [vmem:[%s7426_s1 + $0x420] sm:$0xf]  ;;  %v4747_v48 = vld [vmem:[%s7426_s1 + $0x42c] sm:$0xf0]  ;;  %v4669_v26 = vld [vmem:[%s7426_s1 + $0x1c4] sm:$0xf]  ;;  %v5508_v37 = vpack.c.bf16 %v31_v22, %v31_v22 }
  0x35   :  { %1463 = vmatpush.bf16.msrb.mxu1 %v3768_v33  ;;  %v3735_v49 = vld [vmem:[%s7426_s1 + $0x520] sm:$0xf]  ;;  %v4779_v51 = vld [vmem:[%s7426_s1 + $0x52c] sm:$0xf0]  ;;  %v3608_v56 = vor.u32 %v4747_v48, %v3607_v47  ;;  %v3305_v27 = vld [vmem:[%s7426_s1 + $0x1d0] sm:$0xf0] }
  0x36   :  { %1476 = vmatpush.bf16.msrb.mxu2 %v3896_v34  ;;  %v3863_v52 = vld [vmem:[%s7426_s1 + $0x620] sm:$0xf]  ;;  %v4811_v53 = vld [vmem:[%s7426_s1 + $0x62c] sm:$0xf0]  ;;  %v3736_v59 = vor.u32 %v4779_v51, %v3735_v49  ;;  %v4701_v28 = vld [vmem:[%s7426_s1 + $0x2c4] sm:$0xf] }
  0x37   :  { %1489 = vmatpush.bf16.msrb.mxu3 %v3132_v38  ;;  %v3591_v57 = vld [vmem:[%s7426_s1 + $0x400] sm:$0xf]  ;;  %v4743_v58 = vld [vmem:[%s7426_s1 + $0x40c] sm:$0xf0]  ;;  %v3864_v60 = vor.u32 %v4811_v53, %v3863_v52  ;;  %v3561_v32 = vld [vmem:[%s7426_s1 + $0x3d0] sm:$0xf0]  ;;  %v3308_v38 = vor.u32 %v4669_v26, %v3305_v27  ;;  %v3436_v39 = vor.u32 %v4701_v28, %v3433_v30 }
  0x38   :  { %1451 = vmatpush.bf16.msrb.mxu0 %v3624_v44  ;;  %v3719_v61 = vld [vmem:[%s7426_s1 + $0x500] sm:$0xf]  ;;  %v4775_v62 = vld [vmem:[%s7426_s1 + $0x50c] sm:$0xf0]  ;;  %v3592_v7 = vor.u32 %v4743_v58, %v3591_v57  ;;  %v4765_v34 = vld [vmem:[%s7426_s1 + $0x4c4] sm:$0xf]  ;;  %v3564_v40 = vor.u32 %v4733_v31, %v3561_v32 }
  0x39   :  { %1464 = vmatpush.bf16.msrb.mxu1 %v3752_v45  ;;  %v3847_v63 = vld [vmem:[%s7426_s1 + $0x600] sm:$0xf]  ;;  %v4807_v1 = vld [vmem:[%s7426_s1 + $0x60c] sm:$0xf0]  ;;  %v3720_v13 = vor.u32 %v4775_v62, %v3719_v61  ;;  %v3689_v35 = vld [vmem:[%s7426_s1 + $0x4d0] sm:$0xf0] }
  0x3a   :  { %1477 = vmatpush.bf16.msrb.mxu2 %v3880_v46  ;;  %v3848_v14 = vor.u32 %v4807_v1, %v3847_v63  ;;  %v32_v18 = vld [vmem:[%s7427_s0 + $0x30] sm:$0xff]  ;;  %v30_v21 = vld [vmem:[%s7427_s0 + $0x20] sm:$0xff]  ;;  %v3692_v44 = vor.u32 %v4765_v34, %v3689_v35 }
  0x3b   :  { %1490 = vmatpush.bf16.msrb.mxu3 %v3116_v50  ;;  %v5498_v33 = vpack.c.bf16 %v32_v18, %v32_v18  ;;  %v5506_v36 = vpack.c.bf16 %v30_v21, %v30_v21  ;;  %v4665_v41 = vld [vmem:[%s7426_s1 + $0x1a4] sm:$0xf]  ;;  %v3417_v45 = vld [vmem:[%s7426_s1 + $0x2b0] sm:$0xf0] }
  0x3c   :  { %1452 = vmatpush.bf16.msrb.mxu0 %v3608_v56  ;;  %v4729_v46 = vld [vmem:[%s7426_s1 + $0x3a4] sm:$0xf]  ;;  %v3545_v47 = vld [vmem:[%s7426_s1 + $0x3b0] sm:$0xf0]  ;;  %v3292_v50 = vor.u32 %v4665_v41, %v3289_v42  ;;  %v3420_v51 = vor.u32 %v4697_v43, %v3417_v45 }
  0x3d   :  { %1465 = vmatpush.bf16.msrb.mxu1 %v3736_v59  ;;  %v4761_v48 = vld [vmem:[%s7426_s1 + $0x4a4] sm:$0xf]  ;;  %v3673_v49 = vld [vmem:[%s7426_s1 + $0x4b0] sm:$0xf0]  ;;  %v3548_v52 = vor.u32 %v4729_v46, %v3545_v47 }
  0x3e   :  { %1478 = vmatpush.bf16.msrb.mxu2 %v3864_v60  ;;  %v4661_v53 = vld [vmem:[%s7426_s1 + $0x184] sm:$0xf]  ;;  %v3273_v54 = vld [vmem:[%s7426_s1 + $0x190] sm:$0xf0]  ;;  %v3676_v56 = vor.u32 %v4761_v48, %v3673_v49 }
  0x3f   :  { %1491 = vmatpush.bf16.msrb.mxu3 %v3100_v0  ;;  %v4693_v55 = vld [vmem:[%s7426_s1 + $0x284] sm:$0xf]  ;;  %v3401_v57 = vld [vmem:[%s7426_s1 + $0x290] sm:$0xf0]  ;;  %v3276_v62 = vor.u32 %v4661_v53, %v3273_v54 }
  0x40   :  { %1453 = vmatpush.bf16.msrb.mxu0 %v3592_v7  ;;  %v4725_v58 = vld [vmem:[%s7426_s1 + $0x384] sm:$0xf]  ;;  %v3529_v59 = vld [vmem:[%s7426_s1 + $0x390] sm:$0xf0]  ;;  %v3404_v63 = vor.u32 %v4693_v55, %v3401_v57 }
  0x41   :  { %1466 = vmatpush.bf16.msrb.mxu1 %v3720_v13  ;;  %v4757_v60 = vld [vmem:[%s7426_s1 + $0x484] sm:$0xf]  ;;  %v3657_v61 = vld [vmem:[%s7426_s1 + $0x490] sm:$0xf0]  ;;  %v3532_v0 = vor.u32 %v4725_v58, %v3529_v59  ;;  %v3199_v58 = vld [vmem:[%s7426_s1 + $0xe8] sm:$0xf] }
  0x42   :  { %1479 = vmatpush.bf16.msrb.mxu2 %v3848_v14  ;;  %v4657_v1 = vld [vmem:[%s7426_s1 + $0x164] sm:$0xf]  ;;  %v3257_v2 = vld [vmem:[%s7426_s1 + $0x170] sm:$0xf0]  ;;  %v3660_v4 = vor.u32 %v4757_v60, %v3657_v61  ;;  %v4644_v59 = vld [vmem:[%s7426_s1 + $0xf4] sm:$0xf0] }
  0x43   :  { %1492 = vmatpush.bf16.msrb.mxu3 %v3084_v19  ;;  %1454 = vmatmul.bf16.vlgmr.msrb.gmra.mxu0 %v5506_v36  ;;  %v4689_v3 = vld [vmem:[%s7426_s1 + $0x264] sm:$0xf]  ;;  %v3385_v5 = vld [vmem:[%s7426_s1 + $0x270] sm:$0xf0]  ;;  %v3260_v12 = vor.u32 %v4657_v1, %v3257_v2 }
  0x44   :  { %1498 = vmatpush.bf16.msra.mxu0 %v3324_v20  ;;  %1467 = vmatmul.bf16.vlgmr.msrb.gmra.mxu1 %v5508_v37  ;;  %v4721_v6 = vld [vmem:[%s7426_s1 + $0x364] sm:$0xf]  ;;  %v3513_v7 = vld [vmem:[%s7426_s1 + $0x370] sm:$0xf0]  ;;  %v3388_v13 = vor.u32 %v4689_v3, %v3385_v5  ;;  %v3200_v3 = vor.u32 %v4644_v59, %v3199_v58 }
  0x45   :  { %1511 = vmatpush.bf16.msra.mxu1 %v3452_v23  ;;  %1480 = vmatmul.bf16.vlgmr.msrb.gmra.mxu2 %v5498_v33  ;;  %v4753_v10 = vld [vmem:[%s7426_s1 + $0x464] sm:$0xf]  ;;  %v3641_v11 = vld [vmem:[%s7426_s1 + $0x470] sm:$0xf0]  ;;  %v3516_v14 = vor.u32 %v4721_v6, %v3513_v7 }
  0x46   :  { %1524 = vmatpush.bf16.msra.mxu2 %v3580_v24  ;;  %1493 = vmatmul.bf16.vlgmr.msrb.gmra.mxu3 %v5320_v9  ;;  %v4653_v16 = vld [vmem:[%s7426_s1 + $0x144] sm:$0xf]  ;;  %v3241_v17 = vld [vmem:[%s7426_s1 + $0x150] sm:$0xf0]  ;;  %v3644_v19 = vor.u32 %v4753_v10, %v3641_v11  ;;  %v3183_v11 = vld [vmem:[%s7426_s1 + $0xc8] sm:$0xf] }
  0x47   :  { %1537 = vmatpush.bf16.msra.mxu3 %v3708_v29  ;;  %v4685_v18 = vld [vmem:[%s7426_s1 + $0x244] sm:$0xf]  ;;  %v3369_v20 = vld [vmem:[%s7426_s1 + $0x250] sm:$0xf0]  ;;  %v3244_v26 = vor.u32 %v4653_v16, %v3241_v17 }
  0x48   :  { %1499 = vmatpush.bf16.msra.mxu0 %v3308_v38  ;;  %v4717_v21 = vld [vmem:[%s7426_s1 + $0x344] sm:$0xf]  ;;  %v3497_v22 = vld [vmem:[%s7426_s1 + $0x350] sm:$0xf0]  ;;  %v3372_v27 = vor.u32 %v4685_v18, %v3369_v20 }
  0x49   :  { %1512 = vmatpush.bf16.msra.mxu1 %v3436_v39  ;;  %v4749_v23 = vld [vmem:[%s7426_s1 + $0x444] sm:$0xf]  ;;  %v3625_v24 = vld [vmem:[%s7426_s1 + $0x450] sm:$0xf0]  ;;  %v3500_v28 = vor.u32 %v4717_v21, %v3497_v22 }
  0x4a   :  { %1525 = vmatpush.bf16.msra.mxu2 %v3564_v40  ;;  %v4649_v29 = vld [vmem:[%s7426_s1 + $0x124] sm:$0xf]  ;;  %v3225_v30 = vld [vmem:[%s7426_s1 + $0x130] sm:$0xf0]  ;;  %v3628_v32 = vor.u32 %v4749_v23, %v3625_v24  ;;  %v3167_v24 = vld [vmem:[%s7426_s1 + $0xa8] sm:$0xf] }
  0x4b   :  { %1538 = vmatpush.bf16.msra.mxu3 %v3692_v44  ;;  %v4681_v31 = vld [vmem:[%s7426_s1 + $0x224] sm:$0xf]  ;;  %v3353_v34 = vld [vmem:[%s7426_s1 + $0x230] sm:$0xf0]  ;;  %v3228_v41 = vor.u32 %v4649_v29, %v3225_v30 }
  0x4c   :  { %1500 = vmatpush.bf16.msra.mxu0 %v3292_v50  ;;  %v4713_v35 = vld [vmem:[%s7426_s1 + $0x324] sm:$0xf]  ;;  %v3481_v38 = vld [vmem:[%s7426_s1 + $0x330] sm:$0xf0]  ;;  %v3356_v44 = vor.u32 %v4681_v31, %v3353_v34 }
  0x4d   :  { %1513 = vmatpush.bf16.msra.mxu1 %v3420_v51  ;;  %v4745_v39 = vld [vmem:[%s7426_s1 + $0x424] sm:$0xf]  ;;  %v3609_v40 = vld [vmem:[%s7426_s1 + $0x430] sm:$0xf0]  ;;  %v3484_v45 = vor.u32 %v4713_v35, %v3481_v38 }
  0x4e   :  { %1526 = vmatpush.bf16.msra.mxu2 %v3548_v52  ;;  %v4645_v42 = vld [vmem:[%s7426_s1 + $0x104] sm:$0xf]  ;;  %v3209_v43 = vld [vmem:[%s7426_s1 + $0x110] sm:$0xf0]  ;;  %v3612_v49 = vor.u32 %v4745_v39, %v3609_v40  ;;  %v3151_v40 = vld [vmem:[%s7426_s1 + $0x88] sm:$0xf] }
  0x4f   :  { %1539 = vmatpush.bf16.msra.mxu3 %v3676_v56  ;;  %v4677_v46 = vld [vmem:[%s7426_s1 + $0x204] sm:$0xf]  ;;  %v3337_v47 = vld [vmem:[%s7426_s1 + $0x210] sm:$0xf0]  ;;  %v3212_v56 = vor.u32 %v4645_v42, %v3209_v43  ;;  %v3279_v42 = vld [vmem:[%s7426_s1 + $0x188] sm:$0xf] }
  0x50   :  { %1501 = vmatpush.bf16.msra.mxu0 %v3276_v62  ;;  %v4709_v48 = vld [vmem:[%s7426_s1 + $0x304] sm:$0xf]  ;;  %v3465_v50 = vld [vmem:[%s7426_s1 + $0x310] sm:$0xf0]  ;;  %v3340_v60 = vor.u32 %v4677_v46, %v3337_v47  ;;  %v3327_v62 = vld [vmem:[%s7426_s1 + $0x1e8] sm:$0xf] }
  0x51   :  { %1514 = vmatpush.bf16.msra.mxu1 %v3404_v63  ;;  %v4741_v51 = vld [vmem:[%s7426_s1 + $0x404] sm:$0xf]  ;;  %v3593_v52 = vld [vmem:[%s7426_s1 + $0x410] sm:$0xf0]  ;;  %v3468_v61 = vor.u32 %v4709_v48, %v3465_v50  ;;  %v4676_v63 = vld [vmem:[%s7426_s1 + $0x1f4] sm:$0xf0] }
  0x52   :  { %1527 = vmatpush.bf16.msra.mxu2 %v3532_v0  ;;  %v4801_v53 = vld [vmem:[%s7426_s1 + $0x5e4] sm:$0xf]  ;;  %v3833_v54 = vld [vmem:[%s7426_s1 + $0x5f0] sm:$0xf0]  ;;  %v3596_v0 = vor.u32 %v4741_v51, %v3593_v52  ;;  %v3328_v7 = vor.u32 %v4676_v63, %v3327_v62  ;;  %v4664_v43 = vld [vmem:[%s7426_s1 + $0x194] sm:$0xf0] }
  0x53   :  { %1540 = vmatpush.bf16.msra.mxu3 %v3660_v4  ;;  %v4833_v55 = vld [vmem:[%s7426_s1 + $0x6e4] sm:$0xf]  ;;  %v3961_v57 = vld [vmem:[%s7426_s1 + $0x6f0] sm:$0xf0]  ;;  %v3836_v1 = vor.u32 %v4801_v53, %v3833_v54  ;;  %v3280_v50 = vor.u32 %v4664_v43, %v3279_v42  ;;  %v3135_v52 = vld [vmem:[%s7426_s1 + $0x68] sm:$0xf] }
  0x54   :  { %1502 = vmatpush.bf16.msra.mxu0 %v3260_v12  ;;  %v3964_v2 = vor.u32 %v4833_v55, %v3961_v57  ;;  %v4797_v4 = vld [vmem:[%s7426_s1 + $0x5c4] sm:$0xf]  ;;  %v3817_v5 = vld [vmem:[%s7426_s1 + $0x5d0] sm:$0xf0]  ;;  %v4640_v12 = vld [vmem:[%s7426_s1 + $0xd4] sm:$0xf0] }
  0x55   :  { %1515 = vmatpush.bf16.msra.mxu1 %v3388_v13  ;;  %v4829_v6 = vld [vmem:[%s7426_s1 + $0x6c4] sm:$0xf]  ;;  %v3945_v10 = vld [vmem:[%s7426_s1 + $0x6d0] sm:$0xf0]  ;;  %v3311_v13 = vld [vmem:[%s7426_s1 + $0x1c8] sm:$0xf]  ;;  %v3820_v16 = vor.u32 %v4797_v4, %v3817_v5  ;;  %v3184_v18 = vor.u32 %v4640_v12, %v3183_v11 }
  0x56   :  { %1528 = vmatpush.bf16.msra.mxu2 %v3516_v14  ;;  %v4672_v14 = vld [vmem:[%s7426_s1 + $0x1d4] sm:$0xf0]  ;;  %v3948_v17 = vor.u32 %v4829_v6, %v3945_v10  ;;  %v3801_v20 = vld [vmem:[%s7426_s1 + $0x5b0] sm:$0xf0]  ;;  %v4825_v21 = vld [vmem:[%s7426_s1 + $0x6a4] sm:$0xf] }
  0x57   :  { %1541 = vmatpush.bf16.msra.mxu3 %v3644_v19  ;;  %v4793_v19 = vld [vmem:[%s7426_s1 + $0x5a4] sm:$0xf]  ;;  %v3312_v22 = vor.u32 %v4672_v14, %v3311_v13  ;;  %v3929_v23 = vld [vmem:[%s7426_s1 + $0x6b0] sm:$0xf0]  ;;  %v4628_v53 = vld [vmem:[%s7426_s1 + $0x74] sm:$0xf0] }
  0x58   :  { %1503 = vmatpush.bf16.msra.mxu0 %v3244_v26  ;;  %v4636_v26 = vld [vmem:[%s7426_s1 + $0xb4] sm:$0xf0]  ;;  %v3804_v29 = vor.u32 %v4793_v19, %v3801_v20  ;;  %v3932_v30 = vor.u32 %v4825_v21, %v3929_v23  ;;  %v3785_v34 = vld [vmem:[%s7426_s1 + $0x590] sm:$0xf0]  ;;  %v4821_v35 = vld [vmem:[%s7426_s1 + $0x684] sm:$0xf]  ;;  %v3136_v58 = vor.u32 %v4628_v53, %v3135_v52 }
  0x59   :  { %1516 = vmatpush.bf16.msra.mxu1 %v3372_v27  ;;  %v3295_v27 = vld [vmem:[%s7426_s1 + $0x1a8] sm:$0xf]  ;;  %v3168_v31 = vor.u32 %v4636_v26, %v3167_v24  ;;  %v3913_v39 = vld [vmem:[%s7426_s1 + $0x690] sm:$0xf0]  ;;  %v4785_v47 = vld [vmem:[%s7426_s1 + $0x564] sm:$0xf] }
  0x5a   :  { %1529 = vmatpush.bf16.msra.mxu2 %v3500_v28  ;;  %v4668_v28 = vld [vmem:[%s7426_s1 + $0x1b4] sm:$0xf0]  ;;  %v3769_v48 = vld [vmem:[%s7426_s1 + $0x570] sm:$0xf0]  ;;  %v3263_v54 = vld [vmem:[%s7426_s1 + $0x168] sm:$0xf] }
  0x5b   :  { %1542 = vmatpush.bf16.msra.mxu3 %v3628_v32  ;;  %v4789_v32 = vld [vmem:[%s7426_s1 + $0x584] sm:$0xf]  ;;  %v3296_v38 = vor.u32 %v4668_v28, %v3295_v27  ;;  %v3897_v51 = vld [vmem:[%s7426_s1 + $0x670] sm:$0xf0]  ;;  %v4660_v55 = vld [vmem:[%s7426_s1 + $0x174] sm:$0xf0] }
  0x5c   :  { %1504 = vmatpush.bf16.msra.mxu0 %v3228_v41  ;;  %v4632_v41 = vld [vmem:[%s7426_s1 + $0x94] sm:$0xf0]  ;;  %v4781_v59 = vld [vmem:[%s7426_s1 + $0x544] sm:$0xf]  ;;  %v3264_v62 = vor.u32 %v4660_v55, %v3263_v54  ;;  %v3881_v63 = vld [vmem:[%s7426_s1 + $0x650] sm:$0xf0] }
  0x5d   :  { %1517 = vmatpush.bf16.msra.mxu1 %v3356_v44  ;;  %v3788_v44 = vor.u32 %v4789_v32, %v3785_v34  ;;  %v3152_v46 = vor.u32 %v4632_v41, %v3151_v40  ;;  %v3737_v10 = vld [vmem:[%s7426_s1 + $0x530] sm:$0xf0]  ;;  %v4809_v11 = vld [vmem:[%s7426_s1 + $0x624] sm:$0xf]  ;;  %v3103_v14 = vld [vmem:[%s7426_s1 + $0x28] sm:$0xf] }
  0x5e   :  { %1530 = vmatpush.bf16.msra.mxu2 %v3484_v45  ;;  %v3916_v45 = vor.u32 %v4821_v35, %v3913_v39  ;;  %v3865_v13 = vld [vmem:[%s7426_s1 + $0x630] sm:$0xf0]  ;;  %v4773_v20 = vld [vmem:[%s7426_s1 + $0x504] sm:$0xf]  ;;  %v3087_v27 = vld [vmem:[%s7426_s1 + $0x8] sm:$0xf] }
  0x5f   :  { %1543 = vmatpush.bf16.msra.mxu3 %v3612_v49  ;;  %v4817_v49 = vld [vmem:[%s7426_s1 + $0x664] sm:$0xf]  ;;  %v3721_v21 = vld [vmem:[%s7426_s1 + $0x510] sm:$0xf0]  ;;  %v3455_v32 = vld [vmem:[%s7426_s1 + $0x2e8] sm:$0xf] }
  0x60   :  { %1505 = vmatpush.bf16.msra.mxu0 %v3212_v56  ;;  %v3772_v56 = vor.u32 %v4785_v47, %v3769_v48  ;;  %v3900_v57 = vor.u32 %v4817_v49, %v3897_v51  ;;  %v4805_v24 = vld [vmem:[%s7426_s1 + $0x604] sm:$0xf]  ;;  %v3849_v26 = vld [vmem:[%s7426_s1 + $0x610] sm:$0xf0]  ;;  %v4708_v34 = vld [vmem:[%s7426_s1 + $0x2f4] sm:$0xf0] }
  0x61   :  { %1518 = vmatpush.bf16.msra.mxu1 %v3340_v60  ;;  %v3753_v60 = vld [vmem:[%s7426_s1 + $0x550] sm:$0xf0]  ;;  %v3583_v35 = vld [vmem:[%s7426_s1 + $0x3e8] sm:$0xf]  ;;  %v4740_v39 = vld [vmem:[%s7426_s1 + $0x3f4] sm:$0xf0]  ;;  %v3852_v42 = vor.u32 %v4805_v24, %v3849_v26  ;;  %v3456_v47 = vor.u32 %v4708_v34, %v3455_v32 }
  0x62   :  { %1531 = vmatpush.bf16.msra.mxu2 %v3468_v61  ;;  %v4813_v61 = vld [vmem:[%s7426_s1 + $0x644] sm:$0xf]  ;;  %v3756_v4 = vor.u32 %v4781_v59, %v3753_v60  ;;  %v3711_v40 = vld [vmem:[%s7426_s1 + $0x4e8] sm:$0xf]  ;;  %v4772_v41 = vld [vmem:[%s7426_s1 + $0x4f4] sm:$0xf0]  ;;  %v3584_v48 = vor.u32 %v4740_v39, %v3583_v35 }
  0x63   :  { %1544 = vmatpush.bf16.msra.mxu3 %v3596_v0  ;;  %1506 = vmatmul.bf16.vlgmr.msra.gmra.mxu0 %v5357_v25  ;;  %v3119_v0 = vld [vmem:[%s7426_s1 + $0x48] sm:$0xf]  ;;  %v3884_v5 = vor.u32 %v4813_v61, %v3881_v63  ;;  %v3712_v49 = vor.u32 %v4772_v41, %v3711_v40  ;;  %v4704_v51 = vld [vmem:[%s7426_s1 + $0x2d4] sm:$0xf0] }
  0x64   :  { %1550 = vmatpush.bf16.msrb.mxu0 %v3836_v1  ;;  %1519 = vmatmul.bf16.vlgmr.msra.gmra.mxu1 %v5318_v8  ;;  %v4624_v1 = vld [vmem:[%s7426_s1 + $0x54] sm:$0xf0]  ;;  %v3567_v52 = vld [vmem:[%s7426_s1 + $0x3c8] sm:$0xf] }
  0x65   :  { %1563 = vmatpush.bf16.msrb.mxu1 %v3964_v2  ;;  %1532 = vmatmul.bf16.vlgmr.msra.gmra.mxu2 %v5334_v15  ;;  %v3247_v2 = vld [vmem:[%s7426_s1 + $0x148] sm:$0xf]  ;;  %v3120_v6 = vor.u32 %v4624_v1, %v3119_v0  ;;  %v4736_v54 = vld [vmem:[%s7426_s1 + $0x3d4] sm:$0xf0] }
  0x66   :  { %1576 = vmatpush.bf16.msrb.mxu2 %v3200_v3  ;;  %1545 = vmatmul.bf16.vlgmr.msra.gmra.mxu3 %v5506_v36  ;;  %v4656_v3 = vld [vmem:[%s7426_s1 + $0x154] sm:$0xf0]  ;;  %v3695_v55 = vld [vmem:[%s7426_s1 + $0x4c8] sm:$0xf]  ;;  %v3568_v60 = vor.u32 %v4736_v54, %v3567_v52 }
  0x67   :  { %1589 = vmatpush.bf16.msrb.mxu3 %v3328_v7  ;;  %v4777_v7 = vld [vmem:[%s7426_s1 + $0x524] sm:$0xf]  ;;  %v3248_v12 = vor.u32 %v4656_v3, %v3247_v2  ;;  %v4700_v63 = vld [vmem:[%s7426_s1 + $0x2b4] sm:$0xf0]  ;;  %v3551_v0 = vld [vmem:[%s7426_s1 + $0x3a8] sm:$0xf] }
  0x68   :  { %1551 = vmatpush.bf16.msrb.mxu0 %v3820_v16  ;;  %v4620_v16 = vld [vmem:[%s7426_s1 + $0x34] sm:$0xf0]  ;;  %v3740_v19 = vor.u32 %v4777_v7, %v3737_v10  ;;  %v3679_v3 = vld [vmem:[%s7426_s1 + $0x4a8] sm:$0xf] }
  0x69   :  { %1564 = vmatpush.bf16.msrb.mxu1 %v3948_v17  ;;  %v3231_v17 = vld [vmem:[%s7426_s1 + $0x128] sm:$0xf]  ;;  %v3104_v23 = vor.u32 %v4620_v16, %v3103_v14  ;;  %v4732_v2 = vld [vmem:[%s7426_s1 + $0x3b4] sm:$0xf0] }
  0x6a   :  { %1577 = vmatpush.bf16.msrb.mxu2 %v3184_v18  ;;  %v4652_v18 = vld [vmem:[%s7426_s1 + $0x134] sm:$0xf0]  ;;  %v3552_v10 = vor.u32 %v4732_v2, %v3551_v0  ;;  %v3535_v14 = vld [vmem:[%s7426_s1 + $0x388] sm:$0xf] }
  0x6b   :  { %1590 = vmatpush.bf16.msrb.mxu3 %v3312_v22  ;;  %v3868_v22 = vor.u32 %v4809_v11, %v3865_v13  ;;  %v3232_v28 = vor.u32 %v4652_v18, %v3231_v17  ;;  %v4696_v13 = vld [vmem:[%s7426_s1 + $0x294] sm:$0xf0]  ;;  %v3663_v18 = vld [vmem:[%s7426_s1 + $0x488] sm:$0xf] }
  0x6c   :  { %1552 = vmatpush.bf16.msrb.mxu0 %v3804_v29  ;;  %v4616_v29 = vld [vmem:[%s7426_s1 + $0x14] sm:$0xf0]  ;;  %v3391_v26 = vld [vmem:[%s7426_s1 + $0x268] sm:$0xf] }
  0x6d   :  { %1565 = vmatpush.bf16.msrb.mxu1 %v3932_v30  ;;  %v3215_v30 = vld [vmem:[%s7426_s1 + $0x108] sm:$0xf]  ;;  %v3088_v43 = vor.u32 %v4616_v29, %v3087_v27  ;;  %v4728_v17 = vld [vmem:[%s7426_s1 + $0x394] sm:$0xf0] }
  0x6e   :  { %1578 = vmatpush.bf16.msrb.mxu2 %v3168_v31  ;;  %v4648_v31 = vld [vmem:[%s7426_s1 + $0x114] sm:$0xf0]  ;;  %v3775_v34 = vld [vmem:[%s7426_s1 + $0x568] sm:$0xf] }
  0x6f   :  { %1591 = vmatpush.bf16.msrb.mxu3 %v3296_v38  ;;  %v3724_v38 = vor.u32 %v4773_v20, %v3721_v21  ;;  %v3791_v20 = vld [vmem:[%s7426_s1 + $0x588] sm:$0xf]  ;;  %v4792_v21 = vld [vmem:[%s7426_s1 + $0x594] sm:$0xf0] }
  0x70   :  { %1553 = vmatpush.bf16.msrb.mxu0 %v3788_v44  ;;  %v3839_v44 = vld [vmem:[%s7426_s1 + $0x5e8] sm:$0xf]  ;;  %v4692_v27 = vld [vmem:[%s7426_s1 + $0x274] sm:$0xf0]  ;;  %v3792_v29 = vor.u32 %v4792_v21, %v3791_v20 }
  0x71   :  { %1566 = vmatpush.bf16.msrb.mxu1 %v3916_v45  ;;  %v4804_v45 = vld [vmem:[%s7426_s1 + $0x5f4] sm:$0xf0]  ;;  %v3375_v41 = vld [vmem:[%s7426_s1 + $0x248] sm:$0xf] }
  0x72   :  { %1579 = vmatpush.bf16.msrb.mxu2 %v3152_v46  ;;  %v3216_v46 = vor.u32 %v4648_v31, %v3215_v30  ;;  %v3840_v53 = vor.u32 %v4804_v45, %v3839_v44  ;;  %v4724_v30 = vld [vmem:[%s7426_s1 + $0x374] sm:$0xf0]  ;;  %v3647_v31 = vld [vmem:[%s7426_s1 + $0x468] sm:$0xf] }
  0x73   :  { %1592 = vmatpush.bf16.msrb.mxu3 %v3280_v50  ;;  %v3439_v50 = vld [vmem:[%s7426_s1 + $0x2c8] sm:$0xf]  ;;  %v4756_v32 = vld [vmem:[%s7426_s1 + $0x474] sm:$0xf0] }
  0x74   :  { %1554 = vmatpush.bf16.msrb.mxu0 %v3772_v56  ;;  %v4768_v56 = vld [vmem:[%s7426_s1 + $0x4d4] sm:$0xf0]  ;;  %v3440_v59 = vor.u32 %v4704_v51, %v3439_v50  ;;  %v3648_v40 = vor.u32 %v4756_v32, %v3647_v31  ;;  %v4638_v31 = vld [vmem:[%s7426_s1 + $0xcc] sm:$0xf] }
  0x75   :  { %1567 = vmatpush.bf16.msrb.mxu1 %v3900_v57  ;;  %v3823_v57 = vld [vmem:[%s7426_s1 + $0x5c8] sm:$0xf]  ;;  %v3696_v61 = vor.u32 %v4768_v56, %v3695_v55  ;;  %v4788_v35 = vld [vmem:[%s7426_s1 + $0x574] sm:$0xf0] }
  0x76   :  { %1580 = vmatpush.bf16.msrb.mxu2 %v3136_v58  ;;  %v4800_v58 = vld [vmem:[%s7426_s1 + $0x5d4] sm:$0xf0]  ;;  %v3776_v44 = vor.u32 %v4788_v35, %v3775_v34  ;;  %v3487_v55 = vld [vmem:[%s7426_s1 + $0x328] sm:$0xf]  ;;  %v3185_v34 = vld [vmem:[%s7426_s1 + $0xd8] sm:$0xf0] }
  0x77   :  { %1593 = vmatpush.bf16.msrb.mxu3 %v3264_v62  ;;  %v3423_v62 = vld [vmem:[%s7426_s1 + $0x2a8] sm:$0xf]  ;;  %v3824_v1 = vor.u32 %v4800_v58, %v3823_v57  ;;  %v4720_v45 = vld [vmem:[%s7426_s1 + $0x354] sm:$0xf0]  ;;  %v4670_v35 = vld [vmem:[%s7426_s1 + $0x1cc] sm:$0xf] }
  0x78   :  { %1555 = vmatpush.bf16.msrb.mxu0 %v3756_v4  ;;  %v4764_v4 = vld [vmem:[%s7426_s1 + $0x4b4] sm:$0xf0]  ;;  %v3424_v7 = vor.u32 %v4700_v63, %v3423_v62  ;;  %v3615_v58 = vld [vmem:[%s7426_s1 + $0x428] sm:$0xf] }
  0x79   :  { %1568 = vmatpush.bf16.msrb.mxu1 %v3884_v5  ;;  %v3807_v5 = vld [vmem:[%s7426_s1 + $0x5a8] sm:$0xf]  ;;  %v3680_v11 = vor.u32 %v4764_v4, %v3679_v3  ;;  %v4684_v54 = vld [vmem:[%s7426_s1 + $0x234] sm:$0xf0] }
  0x7a   :  { %1581 = vmatpush.bf16.msrb.mxu2 %v3120_v6  ;;  %v4796_v6 = vld [vmem:[%s7426_s1 + $0x5b4] sm:$0xf0]  ;;  %v3343_v63 = vld [vmem:[%s7426_s1 + $0x208] sm:$0xf] }
  0x7b   :  { %1594 = vmatpush.bf16.msrb.mxu3 %v3248_v12  ;;  %v3407_v12 = vld [vmem:[%s7426_s1 + $0x288] sm:$0xf]  ;;  %v3808_v16 = vor.u32 %v4796_v6, %v3807_v5  ;;  %v4716_v57 = vld [vmem:[%s7426_s1 + $0x334] sm:$0xf0] }
  0x7c   :  { %1556 = vmatpush.bf16.msrb.mxu0 %v3740_v19  ;;  %v4760_v19 = vld [vmem:[%s7426_s1 + $0x494] sm:$0xf0]  ;;  %v3471_v3 = vld [vmem:[%s7426_s1 + $0x308] sm:$0xf] }
  0x7d   :  { %1569 = vmatpush.bf16.msrb.mxu1 %v3868_v22  ;;  %v3408_v22 = vor.u32 %v4696_v13, %v3407_v12  ;;  %v3664_v24 = vor.u32 %v4760_v19, %v3663_v18  ;;  %v4680_v0 = vld [vmem:[%s7426_s1 + $0x214] sm:$0xf0]  ;;  %v3599_v5 = vld [vmem:[%s7426_s1 + $0x408] sm:$0xf]  ;;  %v4674_v18 = vld [vmem:[%s7426_s1 + $0x1ec] sm:$0xf] }
  0x7e   :  { %1582 = vmatpush.bf16.msrb.mxu2 %v3104_v23  ;;  %v3536_v23 = vor.u32 %v4728_v17, %v3535_v14  ;;  %v4712_v4 = vld [vmem:[%s7426_s1 + $0x314] sm:$0xf0]  ;;  %v3967_v12 = vld [vmem:[%s7426_s1 + $0x6e8] sm:$0xf]  ;;  %v4642_v14 = vld [vmem:[%s7426_s1 + $0xec] sm:$0xf] }
  0x7f   :  { %1595 = vmatpush.bf16.msrb.mxu3 %v3232_v28  ;;  %v3519_v28 = vld [vmem:[%s7426_s1 + $0x368] sm:$0xf]  ;;  %v4836_v13 = vld [vmem:[%s7426_s1 + $0x6f4] sm:$0xf0]  ;;  %v3201_v17 = vld [vmem:[%s7426_s1 + $0xf8] sm:$0xf0]  ;;  %v3472_v20 = vor.u32 %v4712_v4, %v3471_v3 }
  0x80   :  { %1557 = vmatpush.bf16.msrb.mxu0 %v3724_v38  ;;  %v3392_v38 = vor.u32 %v4692_v27, %v3391_v26  ;;  %v3520_v39 = vor.u32 %v4724_v30, %v3519_v28  ;;  %v3329_v19 = vld [vmem:[%s7426_s1 + $0x1f8] sm:$0xf0]  ;;  %v3968_v26 = vor.u32 %v4836_v13, %v3967_v12  ;;  %v3204_v27 = vor.u32 %v4642_v14, %v3201_v17  ;;  %v4832_v30 = vld [vmem:[%s7426_s1 + $0x6d4] sm:$0xf0]  ;;  %v3903_v4 = vld [vmem:[%s7426_s1 + $0x668] sm:$0xf] }
  0x81   :  { %1570 = vmatpush.bf16.msrb.mxu1 %v3852_v42  ;;  %v4688_v42 = vld [vmem:[%s7426_s1 + $0x254] sm:$0xf0]  ;;  %v3332_v28 = vor.u32 %v4674_v18, %v3329_v19  ;;  %v3265_v12 = vld [vmem:[%s7426_s1 + $0x178] sm:$0xf0]  ;;  %v4690_v13 = vld [vmem:[%s7426_s1 + $0x26c] sm:$0xf] }
  0x82   :  { %1583 = vmatpush.bf16.msrb.mxu2 %v3088_v43  ;;  %v3503_v43 = vld [vmem:[%s7426_s1 + $0x348] sm:$0xf]  ;;  %v3376_v50 = vor.u32 %v4688_v42, %v3375_v41  ;;  %v3188_v42 = vor.u32 %v4638_v31, %v3185_v34  ;;  %v3393_v14 = vld [vmem:[%s7426_s1 + $0x278] sm:$0xf0] }
  0x83   :  { %1596 = vmatpush.bf16.msrb.mxu3 %v3216_v46  ;;  %1558 = vmatmul.bf16.vlgmr.msrb.gmra.mxu0 %v5508_v37  ;;  %v3631_v46 = vld [vmem:[%s7426_s1 + $0x448] sm:$0xf]  ;;  %v3504_v51 = vor.u32 %v4720_v45, %v3503_v43  ;;  %v4828_v45 = vld [vmem:[%s7426_s1 + $0x6b4] sm:$0xf0] }
  0x84   :  { %1602 = vmatpush.bf16.msra.mxu0 %v3456_v47  ;;  %1571 = vmatmul.bf16.vlgmr.msrb.gmra.mxu1 %v5498_v33  ;;  %v4752_v47 = vld [vmem:[%s7426_s1 + $0x454] sm:$0xf0] }
  0x85   :  { %1615 = vmatpush.bf16.msra.mxu1 %v3584_v48  ;;  %1584 = vmatmul.bf16.vlgmr.msrb.gmra.mxu2 %v5320_v9  ;;  %v3759_v48 = vld [vmem:[%s7426_s1 + $0x548] sm:$0xf]  ;;  %v3632_v52 = vor.u32 %v4752_v47, %v3631_v46  ;;  %v4634_v46 = vld [vmem:[%s7426_s1 + $0xac] sm:$0xf] }
  0x86   :  { %1628 = vmatpush.bf16.msra.mxu2 %v3712_v49  ;;  %1597 = vmatmul.bf16.vlgmr.msrb.gmra.mxu3 %v5357_v25  ;;  %v4784_v49 = vld [vmem:[%s7426_s1 + $0x554] sm:$0xf0] }
  0x87   :  { %1641 = vmatpush.bf16.msra.mxu3 %v3840_v53  ;;  %v3359_v53 = vld [vmem:[%s7426_s1 + $0x228] sm:$0xf]  ;;  %v3760_v56 = vor.u32 %v4784_v49, %v3759_v48  ;;  %v3169_v48 = vld [vmem:[%s7426_s1 + $0xb8] sm:$0xf0]  ;;  %v4666_v49 = vld [vmem:[%s7426_s1 + $0x1ac] sm:$0xf] }
  0x88   :  { %1603 = vmatpush.bf16.msra.mxu0 %v3440_v59  ;;  %v4748_v59 = vld [vmem:[%s7426_s1 + $0x434] sm:$0xf0]  ;;  %v3360_v62 = vor.u32 %v4684_v54, %v3359_v53  ;;  %v3172_v54 = vor.u32 %v4634_v46, %v3169_v48  ;;  %v3361_v46 = vld [vmem:[%s7426_s1 + $0x238] sm:$0xf0] }
  0x89   :  { %1616 = vmatpush.bf16.msra.mxu1 %v3568_v60  ;;  %v3743_v60 = vld [vmem:[%s7426_s1 + $0x528] sm:$0xf]  ;;  %v3616_v2 = vor.u32 %v4748_v59, %v3615_v58  ;;  %v4630_v58 = vld [vmem:[%s7426_s1 + $0x8c] sm:$0xf] }
  0x8a   :  { %1629 = vmatpush.bf16.msra.mxu2 %v3696_v61  ;;  %v4780_v61 = vld [vmem:[%s7426_s1 + $0x534] sm:$0xf0] }
  0x8b   :  { %1642 = vmatpush.bf16.msra.mxu3 %v3824_v1  ;;  %v3488_v1 = vor.u32 %v4716_v57, %v3487_v55  ;;  %v3744_v6 = vor.u32 %v4780_v61, %v3743_v60  ;;  %v4824_v57 = vld [vmem:[%s7426_s1 + $0x694] sm:$0xf0]  ;;  %v3153_v60 = vld [vmem:[%s7426_s1 + $0x98] sm:$0xf0]  ;;  %v4662_v61 = vld [vmem:[%s7426_s1 + $0x18c] sm:$0xf] }
  0x8c   :  { %1604 = vmatpush.bf16.msra.mxu0 %v3424_v7  ;;  %v4744_v7 = vld [vmem:[%s7426_s1 + $0x414] sm:$0xf0] }
  0x8d   :  { %1617 = vmatpush.bf16.msra.mxu1 %v3552_v10  ;;  %v3727_v10 = vld [vmem:[%s7426_s1 + $0x508] sm:$0xf]  ;;  %v3600_v21 = vor.u32 %v4744_v7, %v3599_v5  ;;  %v4820_v5 = vld [vmem:[%s7426_s1 + $0x674] sm:$0xf0] }
  0x8e   :  { %1630 = vmatpush.bf16.msra.mxu2 %v3680_v11  ;;  %v4776_v11 = vld [vmem:[%s7426_s1 + $0x514] sm:$0xf0] }
  0x8f   :  { %1643 = vmatpush.bf16.msra.mxu3 %v3808_v16  ;;  %v3344_v16 = vor.u32 %v4680_v0, %v3343_v63  ;;  %v4694_v63 = vld [vmem:[%s7426_s1 + $0x28c] sm:$0xf]  ;;  %v3409_v0 = vld [vmem:[%s7426_s1 + $0x298] sm:$0xf0] }
  0x90   :  { %1605 = vmatpush.bf16.msra.mxu0 %v3408_v22  ;;  %v4706_v22 = vld [vmem:[%s7426_s1 + $0x2ec] sm:$0xf]  ;;  %v3412_v7 = vor.u32 %v4694_v63, %v3409_v0 }
  0x91   :  { %1618 = vmatpush.bf16.msra.mxu1 %v3536_v23  ;;  %v3457_v23 = vld [vmem:[%s7426_s1 + $0x2f8] sm:$0xf0]  ;;  %v4770_v63 = vld [vmem:[%s7426_s1 + $0x4ec] sm:$0xf] }
  0x92   :  { %1631 = vmatpush.bf16.msra.mxu2 %v3664_v24  ;;  %v3728_v24 = vor.u32 %v4776_v11, %v3727_v10  ;;  %v3460_v32 = vor.u32 %v4706_v22, %v3457_v23  ;;  %v3137_v10 = vld [vmem:[%s7426_s1 + $0x78] sm:$0xf0]  ;;  %v4658_v11 = vld [vmem:[%s7426_s1 + $0x16c] sm:$0xf]  ;;  %v3396_v23 = vor.u32 %v4690_v13, %v3393_v14 }
  0x93   :  { %1644 = vmatpush.bf16.msra.mxu3 %v3792_v29  ;;  %v3951_v29 = vld [vmem:[%s7426_s1 + $0x6c8] sm:$0xf]  ;;  %v3268_v19 = vor.u32 %v4658_v11, %v3265_v12  ;;  %v4622_v22 = vld [vmem:[%s7426_s1 + $0x4c] sm:$0xf] }
  0x94   :  { %1606 = vmatpush.bf16.msra.mxu0 %v3392_v38  ;;  %v3313_v38 = vld [vmem:[%s7426_s1 + $0x1d8] sm:$0xf0]  ;;  %v3952_v41 = vor.u32 %v4832_v30, %v3951_v29 }
  0x95   :  { %1619 = vmatpush.bf16.msra.mxu1 %v3520_v39  ;;  %v4702_v39 = vld [vmem:[%s7426_s1 + $0x2cc] sm:$0xf]  ;;  %v3316_v43 = vor.u32 %v4670_v35, %v3313_v38  ;;  %v3377_v29 = vld [vmem:[%s7426_s1 + $0x258] sm:$0xf0]  ;;  %v3871_v35 = vld [vmem:[%s7426_s1 + $0x628] sm:$0xf] }
  0x96   :  { %1632 = vmatpush.bf16.msra.mxu2 %v3648_v40  ;;  %v3441_v40 = vld [vmem:[%s7426_s1 + $0x2d8] sm:$0xf0]  ;;  %v4812_v38 = vld [vmem:[%s7426_s1 + $0x634] sm:$0xf0] }
  0x97   :  { %1645 = vmatpush.bf16.msra.mxu3 %v3776_v44  ;;  %v3935_v44 = vld [vmem:[%s7426_s1 + $0x6a8] sm:$0xf]  ;;  %v3444_v47 = vor.u32 %v4702_v39, %v3441_v40  ;;  %v4618_v39 = vld [vmem:[%s7426_s1 + $0x2c] sm:$0xf]  ;;  %v3872_v48 = vor.u32 %v4812_v38, %v3871_v35  ;;  %v3553_v35 = vld [vmem:[%s7426_s1 + $0x3b8] sm:$0xf0] }
  0x98   :  { %1607 = vmatpush.bf16.msra.mxu0 %v3376_v50  ;;  %v3297_v50 = vld [vmem:[%s7426_s1 + $0x1b8] sm:$0xf0]  ;;  %v3936_v53 = vor.u32 %v4828_v45, %v3935_v44  ;;  %v4682_v45 = vld [vmem:[%s7426_s1 + $0x22c] sm:$0xf] }
  0x99   :  { %1620 = vmatpush.bf16.msra.mxu1 %v3504_v51  ;;  %v4698_v51 = vld [vmem:[%s7426_s1 + $0x2ac] sm:$0xf]  ;;  %v3300_v55 = vor.u32 %v4666_v49, %v3297_v50  ;;  %v3855_v49 = vld [vmem:[%s7426_s1 + $0x608] sm:$0xf]  ;;  %v4808_v50 = vld [vmem:[%s7426_s1 + $0x614] sm:$0xf0] }
  0x9a   :  { %1633 = vmatpush.bf16.msra.mxu2 %v3632_v52  ;;  %v3425_v52 = vld [vmem:[%s7426_s1 + $0x2b8] sm:$0xf0]  ;;  %v3856_v0 = vor.u32 %v4808_v50, %v3855_v49  ;;  %v4762_v38 = vld [vmem:[%s7426_s1 + $0x4ac] sm:$0xf] }
  0x9b   :  { %1646 = vmatpush.bf16.msra.mxu3 %v3760_v56  ;;  %v3919_v56 = vld [vmem:[%s7426_s1 + $0x688] sm:$0xf]  ;;  %v3428_v59 = vor.u32 %v4698_v51, %v3425_v52  ;;  %v3537_v50 = vld [vmem:[%s7426_s1 + $0x398] sm:$0xf0] }
  0x9c   :  { %1608 = vmatpush.bf16.msra.mxu0 %v3360_v62  ;;  %v3281_v62 = vld [vmem:[%s7426_s1 + $0x198] sm:$0xf0] }
  0x9d   :  { %1621 = vmatpush.bf16.msra.mxu1 %v3488_v1  ;;  %v3920_v1 = vor.u32 %v4824_v57, %v3919_v56  ;;  %v3284_v3 = vor.u32 %v4662_v61, %v3281_v62  ;;  %v4646_v56 = vld [vmem:[%s7426_s1 + $0x10c] sm:$0xf]  ;;  %v3364_v57 = vor.u32 %v4682_v45, %v3361_v46  ;;  %v3585_v62 = vld [vmem:[%s7426_s1 + $0x3f8] sm:$0xf0] }
  0x9e   :  { %1634 = vmatpush.bf16.msra.mxu2 %v3616_v2  ;;  %v3156_v2 = vor.u32 %v4630_v58, %v3153_v60  ;;  %v3217_v58 = vld [vmem:[%s7426_s1 + $0x118] sm:$0xf0]  ;;  %v4738_v61 = vld [vmem:[%s7426_s1 + $0x3ec] sm:$0xf] }
  0x9f   :  { %1647 = vmatpush.bf16.msra.mxu3 %v3744_v6  ;;  %v4626_v6 = vld [vmem:[%s7426_s1 + $0x6c] sm:$0xf]  ;;  %v3345_v60 = vld [vmem:[%s7426_s1 + $0x218] sm:$0xf0]  ;;  %v3588_v12 = vor.u32 %v4738_v61, %v3585_v62 }
  0xa0   :  { %1609 = vmatpush.bf16.msra.mxu0 %v3344_v16  ;;  %v3904_v16 = vor.u32 %v4820_v5, %v3903_v4  ;;  %v3140_v18 = vor.u32 %v4626_v6, %v3137_v10  ;;  %v3220_v6 = vor.u32 %v4646_v56, %v3217_v58  ;;  %v3969_v10 = vld [vmem:[%s7426_s1 + $0x6f8] sm:$0xf0]  ;;  %v4722_v61 = vld [vmem:[%s7426_s1 + $0x36c] sm:$0xf] }
  0xa1   :  { %1622 = vmatpush.bf16.msra.mxu1 %v3472_v20  ;;  %v3887_v20 = vld [vmem:[%s7426_s1 + $0x648] sm:$0xf]  ;;  %v6200_v31 = vpop.f32.mrf.mxu1  ;;  %v3937_v45 = vld [vmem:[%s7426_s1 + $0x6b8] sm:$0xf0] }
  0xa2   :  { %1635 = vmatpush.bf16.msra.mxu2 %v3600_v21  ;;  %v4816_v21 = vld [vmem:[%s7426_s1 + $0x654] sm:$0xf0]  ;;  %v3521_v62 = vld [vmem:[%s7426_s1 + $0x378] sm:$0xf0] }
  0xa3   :  { %1648 = vmatpush.bf16.msra.mxu3 %v3728_v24  ;;  %1610 = vmatmul.bf16.vlgmr.msra.gmra.mxu0 %v5318_v8  ;;  %v3121_v24 = vld [vmem:[%s7426_s1 + $0x58] sm:$0xf0]  ;;  %v3888_v30 = vor.u32 %v4816_v21, %v3887_v20  ;;  %v4766_v20 = vld [vmem:[%s7426_s1 + $0x4cc] sm:$0xf] }
  0xa4   :  { %1654 = vmatpush.bf16.msrb.mxu0 %v3968_v26  ;;  %1623 = vmatmul.bf16.vlgmr.msra.gmra.mxu1 %v5334_v15  ;;  %v4654_v26 = vld [vmem:[%s7426_s1 + $0x14c] sm:$0xf] }
  0xa5   :  { %1667 = vmatpush.bf16.msrb.mxu1 %v3204_v27  ;;  %1636 = vmatmul.bf16.vlgmr.msra.gmra.mxu2 %v5506_v36  ;;  %v3249_v27 = vld [vmem:[%s7426_s1 + $0x158] sm:$0xf0] }
  0xa6   :  { %1680 = vmatpush.bf16.msrb.mxu2 %v3332_v28  ;;  %1649 = vmatmul.bf16.vlgmr.msra.gmra.mxu3 %v5508_v37  ;;  %v4686_v28 = vld [vmem:[%s7426_s1 + $0x24c] sm:$0xf]  ;;  %v3252_v34 = vor.u32 %v4654_v26, %v3249_v27  ;;  %v3825_v26 = vld [vmem:[%s7426_s1 + $0x5d8] sm:$0xf0] }
  0xa7   :  { %1693 = vmatpush.bf16.msrb.mxu3 %v3460_v32  ;;  %v3124_v32 = vor.u32 %v4622_v22, %v3121_v24  ;;  %v3380_v40 = vor.u32 %v4686_v28, %v3377_v29  ;;  %v4798_v24 = vld [vmem:[%s7426_s1 + $0x5cc] sm:$0xf]  ;;  %v3953_v28 = vld [vmem:[%s7426_s1 + $0x6d8] sm:$0xf0] }
  0xa8   :  { %1655 = vmatpush.bf16.msrb.mxu0 %v3952_v41  ;;  %v3105_v41 = vld [vmem:[%s7426_s1 + $0x38] sm:$0xf0]  ;;  %v4830_v27 = vld [vmem:[%s7426_s1 + $0x6cc] sm:$0xf] }
  0xa9   :  { %1668 = vmatpush.bf16.msrb.mxu1 %v3188_v42  ;;  %v4650_v42 = vld [vmem:[%s7426_s1 + $0x12c] sm:$0xf]  ;;  %v3108_v52 = vor.u32 %v4618_v39, %v3105_v41  ;;  %v1418_v4 = vpop.f32.mrf.mxu1  ;;  %v3956_v39 = vor.u32 %v4830_v27, %v3953_v28 }
  0xaa   :  { %1681 = vmatpush.bf16.msrb.mxu2 %v3316_v43  ;;  %v3233_v43 = vld [vmem:[%s7426_s1 + $0x138] sm:$0xf0]  ;;  %v4794_v41 = vld [vmem:[%s7426_s1 + $0x5ac] sm:$0xf] }
  0xab   :  { %1694 = vmatpush.bf16.msrb.mxu3 %v3444_v47  ;;  %v6174_v17 = vpop.f32.mrf.mxu0  ;;  %v6228_v47 = vpop.f32.mrf.mxu3  ;;  %v4818_v4 = vld [vmem:[%s7426_s1 + $0x66c] sm:$0xf] }
  0xac   :  { %1656 = vmatpush.bf16.msrb.mxu0 %v3936_v53  ;;  %v3236_v53 = vor.u32 %v4650_v42, %v3233_v43  ;;  %v3809_v42 = vld [vmem:[%s7426_s1 + $0x5b8] sm:$0xf0]  ;;  %v4826_v43 = vld [vmem:[%s7426_s1 + $0x6ac] sm:$0xf] }
  0xad   :  { %1669 = vmatpush.bf16.msrb.mxu1 %v3172_v54  ;;  %v4614_v54 = vld [vmem:[%s7426_s1 + $0xc] sm:$0xf]  ;;  %v3812_v49 = vor.u32 %v4794_v41, %v3809_v42  ;;  %v3745_v41 = vld [vmem:[%s7426_s1 + $0x538] sm:$0xf0] }
  0xae   :  { %1682 = vmatpush.bf16.msrb.mxu2 %v3300_v55  ;;  %v3089_v55 = vld [vmem:[%s7426_s1 + $0x18] sm:$0xf0]  ;;  %v4810_v42 = vld [vmem:[%s7426_s1 + $0x62c] sm:$0xf] }
  0xaf   :  { %1695 = vmatpush.bf16.msrb.mxu3 %v3428_v59  ;;  %v4678_v59 = vld [vmem:[%s7426_s1 + $0x20c] sm:$0xf]  ;;  %v3092_v5 = vor.u32 %v4614_v54, %v3089_v55  ;;  %v3921_v55 = vld [vmem:[%s7426_s1 + $0x698] sm:$0xf0] }
  0xb0   :  { %1657 = vmatpush.bf16.msrb.mxu0 %v3920_v1  ;;  %v6220_v44 = vpop.f32.mrf.mxu2  ;;  %v3713_v1 = vld [vmem:[%s7426_s1 + $0x4f8] sm:$0xf0]  ;;  %v3348_v11 = vor.u32 %v4678_v59, %v3345_v60  ;;  %v4822_v54 = vld [vmem:[%s7426_s1 + $0x68c] sm:$0xf] }
  0xb1   :  { %1670 = vmatpush.bf16.msrb.mxu1 %v3156_v2  ;;  %v4802_v2 = vld [vmem:[%s7426_s1 + $0x5ec] sm:$0xf]  ;;  %v3716_v14 = vor.u32 %v4770_v63, %v3713_v1  ;;  %v3649_v1 = vld [vmem:[%s7426_s1 + $0x478] sm:$0xf0] }
  0xb2   :  { %1683 = vmatpush.bf16.msrb.mxu2 %v3284_v3  ;;  %v3841_v3 = vld [vmem:[%s7426_s1 + $0x5f8] sm:$0xf0]  ;;  %v4754_v63 = vld [vmem:[%s7426_s1 + $0x46c] sm:$0xf] }
  0xb3   :  { %1696 = vmatpush.bf16.msrb.mxu3 %v3412_v7  ;;  %v1405_v51 = vpop.f32.mrf.mxu0  ;;  %v4834_v7 = vld [vmem:[%s7426_s1 + $0x6ec] sm:$0xf]  ;;  %v1444_v21 = vpop.f32.mrf.mxu3 }
  0xb4   :  { %1658 = vmatpush.bf16.msrb.mxu0 %v3904_v16  ;;  %v3844_v16 = vor.u32 %v4802_v2, %v3841_v3  ;;  %v3972_v22 = vor.u32 %v4834_v7, %v3969_v10  ;;  %v3940_v51 = vor.u32 %v4826_v43, %v3937_v45  ;;  %v4786_v2 = vld [vmem:[%s7426_s1 + $0x56c] sm:$0xf]  ;;  %v3777_v3 = vld [vmem:[%s7426_s1 + $0x578] sm:$0xf0]  ;;  %v3652_v7 = vor.u32 %v4754_v63, %v3649_v1  ;;  %v4215_v63 = vld [vmem:[%s7429_s3 + $0x1e0] sm:$0xf] }
  0xb5   :  { %1671 = vmatpush.bf16.msrb.mxu1 %v3140_v18  ;;  %v4734_v18 = vld [vmem:[%s7426_s1 + $0x3cc] sm:$0xf]  ;;  %v3780_v10 = vor.u32 %v4786_v2, %v3777_v3  ;;  %v3873_v43 = vld [vmem:[%s7426_s1 + $0x638] sm:$0xf0] }
  0xb6   :  { %1684 = vmatpush.bf16.msrb.mxu2 %v3268_v19  ;;  %v3569_v19 = vld [vmem:[%s7426_s1 + $0x3d8] sm:$0xf0]  ;;  %v4814_v21 = vld [vmem:[%s7426_s1 + $0x64c] sm:$0xf] }
  0xb7   :  { %1697 = vmatpush.bf16.msrb.mxu3 %v3396_v23  ;;  %v3697_v23 = vld [vmem:[%s7426_s1 + $0x4d8] sm:$0xf0]  ;;  %v3572_v29 = vor.u32 %v4734_v18, %v3569_v19  ;;  %v4782_v19 = vld [vmem:[%s7426_s1 + $0x54c] sm:$0xf] }
  0xb8   :  { %1659 = vmatpush.bf16.msrb.mxu0 %v3888_v30  ;;  %v1431_v13 = vpop.f32.mrf.mxu2  ;;  %v3700_v30 = vor.u32 %v4766_v20, %v3697_v23  ;;  %v3633_v18 = vld [vmem:[%s7426_s1 + $0x458] sm:$0xf0] }
  0xb9   :  { %1672 = vmatpush.bf16.msrb.mxu1 %v3124_v32  ;;  %v3828_v32 = vor.u32 %v4798_v24, %v3825_v26  ;;  %v4750_v13 = vld [vmem:[%s7426_s1 + $0x44c] sm:$0xf]  ;;  %v3761_v20 = vld [vmem:[%s7426_s1 + $0x558] sm:$0xf0]  ;;  %v6413_v24 = vld [vmem:[%s7428_s2] sm:$0xf] }
  0xba   :  { %1685 = vmatpush.bf16.msrb.mxu2 %v3252_v34  ;;  %v4730_v34 = vld [vmem:[%s7426_s1 + $0x3ac] sm:$0xf]  ;;  %v266_v45 = vperm.slane %v6413_v24, 0 }
  0xbb   :  { %1698 = vmatpush.bf16.msrb.mxu3 %v3380_v40  ;;  %v3681_v40 = vld [vmem:[%s7426_s1 + $0x4b8] sm:$0xf0]  ;;  %v3556_v46 = vor.u32 %v4730_v34, %v3553_v35  ;;  %v4746_v35 = vld [vmem:[%s7426_s1 + $0x42c] sm:$0xf] }
  0xbc   :  { %1660 = vmatpush.bf16.msrb.mxu0 %v3872_v48  ;;  %v3684_v48 = vor.u32 %v4762_v38, %v3681_v40  ;;  %v3489_v34 = vld [vmem:[%s7426_s1 + $0x338] sm:$0xf0]  ;;  %v4778_v40 = vld [vmem:[%s7426_s1 + $0x52c] sm:$0xf] }
  0xbd   :  { %1673 = vmatpush.bf16.msrb.mxu1 %v3108_v52  ;;  %v4790_v52 = vld [vmem:[%s7426_s1 + $0x58c] sm:$0xf] }
  0xbe   :  { %1686 = vmatpush.bf16.msrb.mxu2 %v3236_v53  ;;  %v3793_v53 = vld [vmem:[%s7426_s1 + $0x598] sm:$0xf0] }
  0xbf   :  { %1699 = vmatpush.bf16.msrb.mxu3 %v3364_v57  ;;  %v3796_v60 = vor.u32 %v4790_v52, %v3793_v53  ;;  %v3876_v52 = vor.u32 %v4810_v42, %v3873_v43  ;;  %v4774_v53 = vld [vmem:[%s7426_s1 + $0x50c] sm:$0xf]  ;;  %v4847_v42 = vld [vmem:[%s7429_s3 + $0x4c] sm:$0xf0] }
  0xc0   :  { %1661 = vmatpush.bf16.msrb.mxu0 %v3856_v0  ;;  %v6354_v57 = vpop.f32.mrf.mxu0  ;;  %v3924_v0 = vor.u32 %v4822_v54, %v3921_v55  ;;  %v3729_v54 = vld [vmem:[%s7426_s1 + $0x518] sm:$0xf0]  ;;  %v4806_v55 = vld [vmem:[%s7426_s1 + $0x60c] sm:$0xf] }
  0xc1   :  { %1674 = vmatpush.bf16.msrb.mxu1 %v3092_v5  ;;  %v6356_v58 = vpop.f32.mrf.mxu1  ;;  %v3905_v5 = vld [vmem:[%s7426_s1 + $0x678] sm:$0xf0]  ;;  %v3732_v2 = vor.u32 %v4774_v53, %v3729_v54  ;;  %v4843_v54 = vld [vmem:[%s7429_s3 + $0x2c] sm:$0xf0] }
  0xc2   :  { %1687 = vmatpush.bf16.msrb.mxu2 %v3220_v6  ;;  %v3524_v6 = vor.u32 %v4722_v61, %v3521_v62 }
  0xc3   :  { %1700 = vmatpush.bf16.msrb.mxu3 %v3348_v11  ;;  %1662 = vmatmul.bf16.vlgmr.msrb.gmra.mxu0 %v5498_v33  ;;  %v4718_v11 = vld [vmem:[%s7426_s1 + $0x34c] sm:$0xf] }
  0xc4   :  { %1706 = vmatpush.bf16.msra.mxu0 %v3588_v12  ;;  %1675 = vmatmul.bf16.vlgmr.msrb.gmra.mxu1 %v5320_v9  ;;  %v3665_v9 = vld [vmem:[%s7426_s1 + $0x498] sm:$0xf0] }
  0xc5   :  { %1719 = vmatpush.bf16.msra.mxu1 %v3716_v14  ;;  %1688 = vmatmul.bf16.vlgmr.msrb.gmra.mxu2 %v5357_v25  ;;  %v4726_v25 = vld [vmem:[%s7426_s1 + $0x38c] sm:$0xf]  ;;  %v3505_v12 = vld [vmem:[%s7426_s1 + $0x358] sm:$0xf0] }
  0xc6   :  { %1732 = vmatpush.bf16.msra.mxu2 %v3844_v16  ;;  %1701 = vmatmul.bf16.vlgmr.msrb.gmra.mxu3 %v5318_v8  ;;  %v4758_v8 = vld [vmem:[%s7426_s1 + $0x48c] sm:$0xf]  ;;  %v3540_v56 = vor.u32 %v4726_v25, %v3537_v50  ;;  %v3908_v16 = vor.u32 %v4818_v4, %v3905_v5  ;;  %v3508_v26 = vor.u32 %v4718_v11, %v3505_v12  ;;  %v3473_v50 = vld [vmem:[%s7426_s1 + $0x318] sm:$0xf0]  ;;  %v4199_v11 = vld [vmem:[%s7429_s3 + $0x1c0] sm:$0xf] }
  0xc7   :  { %1745 = vmatpush.bf16.msra.mxu3 %v3972_v22  ;;  %v3668_v59 = vor.u32 %v4758_v8, %v3665_v9  ;;  %v3889_v22 = vld [vmem:[%s7426_s1 + $0x658] sm:$0xf0]  ;;  %v3748_v25 = vor.u32 %v4778_v40, %v3745_v41  ;;  %v4742_v8 = vld [vmem:[%s7426_s1 + $0x40c] sm:$0xf]  ;;  %v1404_v5 = vadd.f32 %v6174_v17, %v266_v45  ;;  %v4895_v12 = vld [vmem:[%s7429_s3 + $0x1cc] sm:$0xf0] }
  0xc8   :  { %1707 = vmatpush.bf16.msra.mxu0 %v3572_v29  ;;  %v6391_v14 = vpop.f32.mrf.mxu2  ;;  %v1457_v27 = vpop.f32.mrf.mxu0  ;;  %v3636_v29 = vor.u32 %v4750_v13, %v3633_v18  ;;  %v3892_v38 = vor.u32 %v4814_v21, %v3889_v22  ;;  %v4055_v18 = vld [vmem:[%s7429_s3 + $0xa0] sm:$0xf] }
  0xc9   :  { %1720 = vmatpush.bf16.msra.mxu1 %v3700_v30  ;;  %v6408_v23 = vpop.f32.mrf.mxu3  ;;  %v1470_v28 = vpop.f32.mrf.mxu1  ;;  %v3764_v30 = vor.u32 %v4782_v19, %v3761_v20  ;;  %v1417_v13 = vadd.f32 %v6200_v31, %v1404_v5  ;;  %v4859_v19 = vld [vmem:[%s7429_s3 + $0xac] sm:$0xf0]  ;;  %v4183_v31 = vld [vmem:[%s7429_s3 + $0x1a0] sm:$0xf] }
  0xca   :  { %1733 = vmatpush.bf16.msra.mxu2 %v3828_v32  ;;  %v4714_v32 = vld [vmem:[%s7426_s1 + $0x32c] sm:$0xf]  ;;  %v4056_v20 = vor.u32 %v4859_v19, %v4055_v18  ;;  %v4343_v45 = vld [vmem:[%s7429_s3 + $0x2e0] sm:$0xf] }
  0xcb   :  { %1746 = vmatpush.bf16.msra.mxu3 %v3956_v39  ;;  %v3617_v39 = vld [vmem:[%s7426_s1 + $0x438] sm:$0xf0]  ;;  %v1430_v21 = vadd.f32 %v6220_v44, %v1417_v13  ;;  %v4311_v5 = vld [vmem:[%s7429_s3 + $0x2a0] sm:$0xf]  ;;  %v4217_v13 = vld [vmem:[%s7429_s3 + $0x1f0] sm:$0xf0] }
  0xcc   :  { %1708 = vmatpush.bf16.msra.mxu0 %v3556_v46  ;;  %v3492_v46 = vor.u32 %v4714_v32, %v3489_v34  ;;  %v4851_v32 = vld [vmem:[%s7429_s3 + $0x6c] sm:$0xf0] }
  0xcd   :  { %1721 = vmatpush.bf16.msra.mxu1 %v3684_v48  ;;  %v4710_v48 = vld [vmem:[%s7426_s1 + $0x30c] sm:$0xf]  ;;  %v1443_v28 = vadd.f32 %v6228_v47, %v1430_v21  ;;  %v4883_v47 = vld [vmem:[%s7429_s3 + $0x16c] sm:$0xf0] }
  0xce   :  { %1734 = vmatpush.bf16.msra.mxu2 %v3812_v49  ;;  %v3620_v49 = vor.u32 %v4746_v35, %v3617_v39  ;;  %v3476_v62 = vor.u32 %v4710_v48, %v3473_v50  ;;  %v4151_v35 = vld [vmem:[%s7429_s3 + $0x160] sm:$0xf]  ;;  %v4879_v48 = vld [vmem:[%s7429_s3 + $0x14c] sm:$0xf0]  ;;  %v267_v50 = vperm.slane %v6413_v24, 1 }
  0xcf   :  { %1747 = vmatpush.bf16.msra.mxu3 %v3940_v51  ;;  %v3601_v51 = vld [vmem:[%s7426_s1 + $0x418] sm:$0xf0]  ;;  %v4007_v39 = vld [vmem:[%s7429_s3 + $0x40] sm:$0xf]  ;;  %v1456_v40 = vadd.f32 %v6354_v57, %v1443_v28  ;;  %v4152_v41 = vor.u32 %v4883_v47, %v4151_v35  ;;  %v4919_v21 = vld [vmem:[%s7429_s3 + $0x28c] sm:$0xf0] }
  0xd0   :  { %1709 = vmatpush.bf16.msra.mxu0 %v3540_v56  ;;  %v1483_v9 = vpop.f32.mrf.mxu2  ;;  %v3857_v56 = vld [vmem:[%s7426_s1 + $0x618] sm:$0xf0]  ;;  %v3604_v1 = vor.u32 %v4742_v8, %v3601_v51  ;;  %v4135_v57 = vld [vmem:[%s7429_s3 + $0x140] sm:$0xf]  ;;  %v4008_v8 = vor.u32 %v4847_v42, %v4007_v39  ;;  %v4057_v47 = vld [vmem:[%s7429_s3 + $0xb0] sm:$0xf0] }
  0xd1   :  { %1722 = vmatpush.bf16.msra.mxu1 %v3668_v59  ;;  %v4087_v59 = vld [vmem:[%s7429_s3 + $0xe0] sm:$0xf]  ;;  %v1496_v61 = vpop.f32.mrf.mxu3  ;;  %v3860_v3 = vor.u32 %v4806_v55, %v3857_v56  ;;  %v4136_v53 = vor.u32 %v4879_v48, %v4135_v57  ;;  %v4889_v39 = vld [vmem:[%s7429_s3 + $0x1a4] sm:$0xf] }
  0xd2   :  { %1735 = vmatpush.bf16.msra.mxu2 %v3796_v60  ;;  %v4867_v60 = vld [vmem:[%s7429_s3 + $0xec] sm:$0xf0]  ;;  %v3991_v51 = vld [vmem:[%s7429_s3 + $0x20] sm:$0xf]  ;;  %v4853_v48 = vld [vmem:[%s7429_s3 + $0x84] sm:$0xf] }
  0xd3   :  { %1748 = vmatpush.bf16.msra.mxu3 %v3924_v0  ;;  %v4899_v0 = vld [vmem:[%s7429_s3 + $0x1ec] sm:$0xf0]  ;;  %v4088_v4 = vor.u32 %v4867_v60, %v4087_v59  ;;  %v4327_v56 = vld [vmem:[%s7429_s3 + $0x2c0] sm:$0xf] }
  0xd4   :  { %1710 = vmatpush.bf16.msra.mxu0 %v3524_v6  ;;  %v4216_v6 = vor.u32 %v4899_v0, %v4215_v63  ;;  %v4927_v59 = vld [vmem:[%s7429_s3 + $0x2cc] sm:$0xf0]  ;;  %v4119_v60 = vld [vmem:[%s7429_s3 + $0x120] sm:$0xf]  ;;  %v3992_v63 = vor.u32 %v4843_v54, %v3991_v51 }
  0xd5   :  { %1723 = vmatpush.bf16.msra.mxu1 %v3652_v7  ;;  %v4071_v7 = vld [vmem:[%s7429_s3 + $0xc0] sm:$0xf]  ;;  %v4328_v61 = vor.u32 %v4927_v59, %v4327_v56  ;;  %v4907_v54 = vld [vmem:[%s7429_s3 + $0x22c] sm:$0xf0] }
  0xd6   :  { %1736 = vmatpush.bf16.msra.mxu2 %v3780_v10  ;;  %v4863_v10 = vld [vmem:[%s7429_s3 + $0xcc] sm:$0xf0]  ;;  %v3975_v0 = vld [vmem:[%s7429_s3] sm:$0xf] }
  0xd7   :  { %1749 = vmatpush.bf16.msra.mxu3 %v3908_v16  ;;  %v4072_v17 = vor.u32 %v4863_v10, %v4071_v7  ;;  %v4200_v16 = vor.u32 %v4895_v12, %v4199_v11  ;;  %v4871_v7 = vld [vmem:[%s7429_s3 + $0x10c] sm:$0xf0]  ;;  %v4089_v10 = vld [vmem:[%s7429_s3 + $0xf0] sm:$0xf0] }
  0xd8   :  { %1711 = vmatpush.bf16.msra.mxu0 %v3508_v26  ;;  %v4167_v26 = vld [vmem:[%s7429_s3 + $0x180] sm:$0xf] }
  0xd9   :  { %1724 = vmatpush.bf16.msra.mxu1 %v3636_v29 }
  0xda   :  { %1737 = vmatpush.bf16.msra.mxu2 %v3764_v30  ;;  %v4023_v30 = vld [vmem:[%s7429_s3 + $0x60] sm:$0xf] }
  0xdb   :  { %1750 = vmatpush.bf16.msra.mxu3 %v3892_v38  ;;  %v4024_v38 = vor.u32 %v4851_v32, %v4023_v30  ;;  %v4279_v30 = vld [vmem:[%s7429_s3 + $0x260] sm:$0xf]  ;;  %v4915_v32 = vld [vmem:[%s7429_s3 + $0x26c] sm:$0xf0] }
  0xdc   :  { %1712 = vmatpush.bf16.msra.mxu0 %v3492_v46  ;;  %v4931_v46 = vld [vmem:[%s7429_s3 + $0x2ec] sm:$0xf0] }
  0xdd   :  { %1725 = vmatpush.bf16.msra.mxu1 %v3620_v49 }
  0xde   :  { %1738 = vmatpush.bf16.msra.mxu2 %v3748_v25  ;;  %v4344_v25 = vor.u32 %v4931_v46, %v4343_v45  ;;  %v4263_v45 = vld [vmem:[%s7429_s3 + $0x240] sm:$0xf]  ;;  %v4911_v46 = vld [vmem:[%s7429_s3 + $0x24c] sm:$0xf0] }
  0xdf   :  { %1751 = vmatpush.bf16.msra.mxu3 %v3876_v52  ;;  %v1469_v52 = vadd.f32 %v6356_v58, %v1456_v40  ;;  %v4875_v58 = vld [vmem:[%s7429_s3 + $0x12c] sm:$0xf0]  ;;  %v4185_v40 = vld [vmem:[%s7429_s3 + $0x1b0] sm:$0xf0] }
  0xe0   :  { %1713 = vmatpush.bf16.msra.mxu0 %v3476_v62  ;;  %v1507_v27 = vpop.f32.mrf.mxu0  ;;  %v1495_v62 = vadd.f32 %v6408_v23, %v267_v50  ;;  %v4188_v57 = vor.u32 %v4889_v39, %v4185_v40  ;;  %v4885_v50 = vld [vmem:[%s7429_s3 + $0x184] sm:$0xf]  ;;  %v4095_v39 = vld [vmem:[%s7429_s3 + $0xe8] sm:$0xf]  ;;  %v4868_v40 = vld [vmem:[%s7429_s3 + $0xf4] sm:$0xf0] }
  0xe1   :  { %1726 = vmatpush.bf16.msra.mxu1 %v3604_v1  ;;  %v6526_v34 = vpop.f32.mrf.mxu1  ;;  %v4839_v1 = vld [vmem:[%s7429_s3 + $0xc] sm:$0xf0] }
  0xe2   :  { %1739 = vmatpush.bf16.msra.mxu2 %v3732_v2  ;;  %v1482_v2 = vadd.f32 %v6391_v14, %v1469_v52  ;;  %v4865_v14 = vld [vmem:[%s7429_s3 + $0xe4] sm:$0xf]  ;;  %v3976_v18 = vor.u32 %v4839_v1, %v3975_v0 }
  0xe3   :  { %1752 = vmatpush.bf16.msra.mxu3 %v3860_v3  ;;  %1714 = vmatmul.bf16.vlgmr.msra.gmra.mxu0 %v5334_v15  ;;  %v4891_v15 = vld [vmem:[%s7429_s3 + $0x1ac] sm:$0xf0]  ;;  %v4120_v3 = vor.u32 %v4875_v58, %v4119_v60  ;;  %v4025_v60 = vld [vmem:[%s7429_s3 + $0x70] sm:$0xf0]  ;;  %v4845_v0 = vld [vmem:[%s7429_s3 + $0x44] sm:$0xf] }
  0xe4   :  { %2544 = vmatpush.bf16.msrb.mxu0 %v4088_v4  ;;  %1727 = vmatmul.bf16.vlgmr.msra.gmra.mxu1 %v5506_v36  ;;  %v4184_v22 = vor.u32 %v4891_v15, %v4183_v31  ;;  %v4039_v36 = vld [vmem:[%s7429_s3 + $0x80] sm:$0xf]  ;;  %v1758_v19 = vmax.f32 %v1482_v2, 0.0  ;;  %v4092_v15 = vor.u32 %v4865_v14, %v4089_v10  ;;  %v4009_v2 = vld [vmem:[%s7429_s3 + $0x50] sm:$0xf0] }
  0xe5   :  { %2557 = vmatpush.bf16.msrb.mxu1 %v4216_v6  ;;  %1740 = vmatmul.bf16.vlgmr.msra.gmra.mxu2 %v5508_v37  ;;  %v4855_v37 = vld [vmem:[%s7429_s3 + $0x8c] sm:$0xf0]  ;;  %v4103_v4 = vld [vmem:[%s7429_s3 + $0x100] sm:$0xf]  ;;  %v4345_v14 = vld [vmem:[%s7429_s3 + $0x2f0] sm:$0xf0] }
  0xe6   :  { %1753 = vmatmul.bf16.vlgmr.msra.gmra.mxu3 %v5498_v33  ;;  %v4887_v33 = vld [vmem:[%s7429_s3 + $0x18c] sm:$0xf0]  ;;  %v4040_v44 = vor.u32 %v4855_v37, %v4039_v36  ;;  %2570 = vmatpush.bf16.msrb.mxu2 %v4344_v25  ;;  %v4104_v31 = vor.u32 %v4871_v7, %v4103_v4  ;;  %v4861_v36 = vld [vmem:[%s7429_s3 + $0xc4] sm:$0xf]  ;;  %v4073_v37 = vld [vmem:[%s7429_s3 + $0xd0] sm:$0xf0]  ;;  %v6628_v28 = vpack.c.bf16 %v1758_v19, %v1758_v19 }
  0xe7   :  { %v4168_v29 = vor.u32 %v4887_v33, %v4167_v26  ;;  %v4923_v6 = vld [vmem:[%s7429_s3 + $0x2ac] sm:$0xf0]  ;;  %v4893_v33 = vld [vmem:[%s7429_s3 + $0x1c4] sm:$0xf]  ;;  %v4264_v25 = vor.u32 %v4911_v46, %v4263_v45  ;;  %v4223_v45 = vld [vmem:[%s7429_s3 + $0x1e8] sm:$0xf] }
  0xe8   :  { %2545 = vmatpush.bf16.msrb.mxu0 %v4072_v17  ;;  %v6541_v43 = vpop.f32.mrf.mxu2  ;;  %v1509_v9 = vpop.f32.mrf.mxu0  ;;  %v4312_v12 = vor.u32 %v4923_v6, %v4311_v5  ;;  %v4897_v17 = vld [vmem:[%s7429_s3 + $0x1e4] sm:$0xf]  ;;  %v4903_v4 = vld [vmem:[%s7429_s3 + $0x20c] sm:$0xf0]  ;;  %v4900_v46 = vld [vmem:[%s7429_s3 + $0x1f4] sm:$0xf0] }
  0xe9   :  { %2558 = vmatpush.bf16.msrb.mxu1 %v4200_v16  ;;  %v6555_v49 = vpop.f32.mrf.mxu3  ;;  %v1522_v55 = vpop.f32.mrf.mxu1  ;;  %v1508_v16 = vadd.f32 %v1507_v27, %v1495_v62  ;;  %v4153_v62 = vld [vmem:[%s7429_s3 + $0x170] sm:$0xf0]  ;;  %v4929_v7 = vld [vmem:[%s7429_s3 + $0x2e4] sm:$0xf] }
  0xea   :  { %2571 = vmatpush.bf16.msrb.mxu2 %v4328_v61  ;;  %v4881_v61 = vld [vmem:[%s7429_s3 + $0x164] sm:$0xf] }
  0xeb   :  { %v1521_v27 = vadd.f32 %v6526_v34, %v1508_v16  ;;  %v4857_v34 = vld [vmem:[%s7429_s3 + $0xa4] sm:$0xf]  ;;  %v4156_v5 = vor.u32 %v4881_v61, %v4153_v62  ;;  %v4012_v16 = vor.u32 %v4845_v0, %v4009_v2  ;;  %v4063_v62 = vld [vmem:[%s7429_s3 + $0xa8] sm:$0xf]  ;;  %v4955_v0 = vld [vmem:[%s7429_s3 + $0x3ac] sm:$0xf0] }
  0xec   :  { %2546 = vmatpush.bf16.msrb.mxu0 %v4056_v20  ;;  %v4295_v20 = vld [vmem:[%s7429_s3 + $0x280] sm:$0xf]  ;;  %v4060_v42 = vor.u32 %v4857_v34, %v4057_v47  ;;  %v4877_v10 = vld [vmem:[%s7429_s3 + $0x144] sm:$0xf]  ;;  %v4963_v47 = vld [vmem:[%s7429_s3 + $0x3ec] sm:$0xf0] }
  0xed   :  { %2559 = vmatpush.bf16.msrb.mxu1 %v4184_v22  ;;  %v4220_v22 = vor.u32 %v4897_v17, %v4217_v13  ;;  %v4296_v26 = vor.u32 %v4919_v21, %v4295_v20  ;;  %v3993_v20 = vld [vmem:[%s7429_s3 + $0x30] sm:$0xf0]  ;;  %v4471_v34 = vld [vmem:[%s7429_s3 + $0x3e0] sm:$0xf]  ;;  %v4860_v2 = vld [vmem:[%s7429_s3 + $0xb4] sm:$0xf0] }
  0xee   :  { %2572 = vmatpush.bf16.msrb.mxu2 %v4312_v12  ;;  %v4348_v12 = vor.u32 %v4929_v7, %v4345_v14  ;;  %v4064_v14 = vor.u32 %v4860_v2, %v4063_v62  ;;  %v4876_v62 = vld [vmem:[%s7429_s3 + $0x134] sm:$0xf0] }
  0xf0   :  { %2547 = vmatpush.bf16.msrb.mxu0 %v4040_v44  ;;  %v1535_v23 = vpop.f32.mrf.mxu2  ;;  %v4201_v44 = vld [vmem:[%s7429_s3 + $0x1d0] sm:$0xf0] }
  0xf1   :  { %2560 = vmatpush.bf16.msrb.mxu1 %v4168_v29  ;;  %v1548_v11 = vpop.f32.mrf.mxu3  ;;  %v4076_v29 = vor.u32 %v4861_v36, %v4073_v37  ;;  %v4204_v35 = vor.u32 %v4893_v33, %v4201_v44  ;;  %v4329_v36 = vld [vmem:[%s7429_s3 + $0x2d0] sm:$0xf0]  ;;  %v4873_v37 = vld [vmem:[%s7429_s3 + $0x124] sm:$0xf] }
  0xf2   :  { %2573 = vmatpush.bf16.msrb.mxu2 %v4296_v26  ;;  %v4137_v11 = vld [vmem:[%s7429_s3 + $0x150] sm:$0xf0]  ;;  %v4837_v44 = vld [vmem:[%s7429_s3 + $0x4] sm:$0xf] }
  0xf3   :  { %v4121_v26 = vld [vmem:[%s7429_s3 + $0x130] sm:$0xf0] }
  0xf4   :  { %2548 = vmatpush.bf16.msrb.mxu0 %v4024_v38  ;;  %v4280_v38 = vor.u32 %v4915_v32, %v4279_v30  ;;  %v4869_v30 = vld [vmem:[%s7429_s3 + $0x104] sm:$0xf]  ;;  %v4105_v32 = vld [vmem:[%s7429_s3 + $0x110] sm:$0xf0] }
  0xf5   :  { %2561 = vmatpush.bf16.msrb.mxu1 %v4152_v41  ;;  %v1534_v41 = vadd.f32 %v6541_v43, %v1521_v27  ;;  %v4041_v43 = vld [vmem:[%s7429_s3 + $0x90] sm:$0xf0] }
  0xf6   :  { %2574 = vmatpush.bf16.msrb.mxu2 %v4280_v38  ;;  %v4044_v52 = vor.u32 %v4853_v48, %v4041_v43  ;;  %v4921_v38 = vld [vmem:[%s7429_s3 + $0x2a4] sm:$0xf] }
  0xf7   :  { %v1547_v51 = vadd.f32 %v6555_v49, %v1534_v41  ;;  %v4849_v49 = vld [vmem:[%s7429_s3 + $0x64] sm:$0xf]  ;;  %v4472_v41 = vor.u32 %v4963_v47, %v4471_v34  ;;  %v4159_v34 = vld [vmem:[%s7429_s3 + $0x168] sm:$0xf]  ;;  %v4884_v47 = vld [vmem:[%s7429_s3 + $0x174] sm:$0xf0] }
  0xf8   :  { %2549 = vmatpush.bf16.msrb.mxu0 %v4008_v8  ;;  %v4169_v8 = vld [vmem:[%s7429_s3 + $0x190] sm:$0xf0]  ;;  %v4028_v1 = vor.u32 %v4849_v49, %v4025_v60  ;;  %v4207_v49 = vld [vmem:[%s7429_s3 + $0x1c8] sm:$0xf]  ;;  %v4896_v60 = vld [vmem:[%s7429_s3 + $0x1d4] sm:$0xf0] }
  0xf9   :  { %2562 = vmatpush.bf16.msrb.mxu1 %v4136_v53  ;;  %v4247_v53 = vld [vmem:[%s7429_s3 + $0x220] sm:$0xf]  ;;  %v4172_v56 = vor.u32 %v4885_v50, %v4169_v8  ;;  %2583 = vmatpush.bf16.msrb.mxu3 %v4472_v41  ;;  %v4108_v50 = vor.u32 %v4869_v30, %v4105_v32  ;;  %v4096_v8 = vor.u32 %v4868_v40, %v4095_v39  ;;  %v4905_v32 = vld [vmem:[%s7429_s3 + $0x224] sm:$0xf] }
  0xfa   :  { %2575 = vmatpush.bf16.msrb.mxu2 %v4264_v25  ;;  %v4248_v58 = vor.u32 %v4907_v54, %v4247_v53  ;;  %v4224_v53 = vor.u32 %v4900_v46, %v4223_v45  ;;  %v4864_v54 = vld [vmem:[%s7429_s3 + $0xd4] sm:$0xf0]  ;;  %v4391_v45 = vld [vmem:[%s7429_s3 + $0x340] sm:$0xf]  ;;  %v4943_v46 = vld [vmem:[%s7429_s3 + $0x34c] sm:$0xf0] }
  0xfc   :  { %2550 = vmatpush.bf16.msrb.mxu0 %v3992_v63 }
  0xfd   :  { %2563 = vmatpush.bf16.msrb.mxu1 %v4120_v3  ;;  %v4231_v3 = vld [vmem:[%s7429_s3 + $0x200] sm:$0xf] }
  0xfe   :  { %2576 = vmatpush.bf16.msrb.mxu2 %v4248_v58  ;;  %v4232_v6 = vor.u32 %v4903_v4, %v4231_v3  ;;  %v4913_v4 = vld [vmem:[%s7429_s3 + $0x264] sm:$0xf] }
 0x100   :  { %2551 = vmatpush.bf16.msrb.mxu0 %v3976_v18  ;;  %v1559_v9 = vpop.f32.mrf.mxu0  ;;  %v4841_v18 = vld [vmem:[%s7429_s3 + $0x24] sm:$0xf] }
 0x101   :  { %2564 = vmatpush.bf16.msrb.mxu1 %v4104_v31  ;;  %v1560_v55 = vadd.f32 %v1559_v9, %v1547_v51  ;;  %v1572_v59 = vpop.f32.mrf.mxu1  ;;  %v3996_v27 = vor.u32 %v4841_v18, %v3993_v20  ;;  %v4079_v51 = vld [vmem:[%s7429_s3 + $0xc8] sm:$0xf]  ;;  %v4455_v9 = vld [vmem:[%s7429_s3 + $0x3c0] sm:$0xf]  ;;  %v4265_v20 = vld [vmem:[%s7429_s3 + $0x250] sm:$0xf0] }
 0x102   :  { %2577 = vmatpush.bf16.msrb.mxu2 %v4232_v6  ;;  %v4080_v61 = vor.u32 %v4864_v54, %v4079_v51  ;;  %v4892_v6 = vld [vmem:[%s7429_s3 + $0x1b4] sm:$0xf0]  ;;  %v4047_v18 = vld [vmem:[%s7429_s3 + $0x88] sm:$0xf] }
 0x103   :  { %2552 = vmatmul.bf16.vlgmr.msrb.gmra.mxu0 %v6628_v28  ;;  %v1573_v63 = vadd.f32 %v1572_v59, %v1560_v55  ;;  %v4297_v59 = vld [vmem:[%s7429_s3 + $0x290] sm:$0xf0]  ;;  %v4143_v51 = vld [vmem:[%s7429_s3 + $0x148] sm:$0xf] }
 0x104   :  { %2596 = vmatpush.bf16.msra.mxu0 %v4092_v15  ;;  %v4140_v15 = vor.u32 %v4877_v10, %v4137_v11  ;;  %v4423_v10 = vld [vmem:[%s7429_s3 + $0x380] sm:$0xf]  ;;  %v4951_v11 = vld [vmem:[%s7429_s3 + $0x38c] sm:$0xf0] }
 0x105   :  { %2609 = vmatpush.bf16.msra.mxu1 %v4220_v22  ;;  %v1759_v23 = vmax.f32 %v1573_v63, 0.0  ;;  %v4925_v22 = vld [vmem:[%s7429_s3 + $0x2c4] sm:$0xf]  ;;  %v4439_v63 = vld [vmem:[%s7429_s3 + $0x3a0] sm:$0xf] }
 0x106   :  { %2622 = vmatpush.bf16.msra.mxu2 %v4348_v12  ;;  %v4332_v33 = vor.u32 %v4925_v22, %v4329_v36  ;;  %v4440_v3 = vor.u32 %v4955_v0, %v4439_v63  ;;  %v4909_v12 = vld [vmem:[%s7429_s3 + $0x244] sm:$0xf]  ;;  %v4888_v22 = vld [vmem:[%s7429_s3 + $0x194] sm:$0xf0] }
 0x107   :  { %v6711_v17 = vpack.c.bf16 %v1759_v23, %v1759_v23  ;;  %v4281_v23 = vld [vmem:[%s7429_s3 + $0x270] sm:$0xf0]  ;;  %v4268_v36 = vor.u32 %v4909_v12, %v4265_v20  ;;  %v4872_v12 = vld [vmem:[%s7429_s3 + $0x114] sm:$0xf0] }
 0x108   :  { %2597 = vmatpush.bf16.msra.mxu0 %v4076_v29  ;;  %v6713_v13 = vpop.f32.mrf.mxu2  ;;  %v1561_v31 = vpop.f32.mrf.mxu0  ;;  %v3977_v29 = vld [vmem:[%s7429_s3 + $0x10] sm:$0xf0]  ;;  %v4284_v7 = vor.u32 %v4913_v4, %v4281_v23  ;;  %v4359_v4 = vld [vmem:[%s7429_s3 + $0x300] sm:$0xf]  ;;  %v4935_v23 = vld [vmem:[%s7429_s3 + $0x30c] sm:$0xf0] }
 0x109   :  { %2610 = vmatpush.bf16.msra.mxu1 %v4204_v35  ;;  %v6718_v19 = vpop.f32.mrf.mxu3  ;;  %v1574_v21 = vpop.f32.mrf.mxu1  ;;  %v4124_v35 = vor.u32 %v4873_v37, %v4121_v26  ;;  %v3980_v43 = vor.u32 %v4837_v44, %v3977_v29  ;;  %v4856_v31 = vld [vmem:[%s7429_s3 + $0x94] sm:$0xf0]  ;;  %v4031_v26 = vld [vmem:[%s7429_s3 + $0x68] sm:$0xf]  ;;  %v4947_v44 = vld [vmem:[%s7429_s3 + $0x36c] sm:$0xf0] }
 0x10a   :  { %2565 = vmatmul.bf16.vlgmr.msrb.gmra.mxu1 %v6711_v17  ;;  %2623 = vmatpush.bf16.msra.mxu2 %v4332_v33  ;;  %v4175_v21 = vld [vmem:[%s7429_s3 + $0x188] sm:$0xf]  ;;  %v4048_v37 = vor.u32 %v4856_v31, %v4047_v18  ;;  %v4407_v33 = vld [vmem:[%s7429_s3 + $0x360] sm:$0xf]  ;;  %v4852_v29 = vld [vmem:[%s7429_s3 + $0x74] sm:$0xf0] }
 0x10b   :  { %v4408_v30 = vor.u32 %v4947_v44, %v4407_v33  ;;  %v4032_v41 = vor.u32 %v4852_v29, %v4031_v26  ;;  %v4097_v18 = vld [vmem:[%s7429_s3 + $0xf8] sm:$0xf0]  ;;  %v4957_v26 = vld [vmem:[%s7429_s3 + $0x3c4] sm:$0xf]  ;;  %v4457_v33 = vld [vmem:[%s7429_s3 + $0x3d0] sm:$0xf0] }
 0x10c   :  { %2598 = vmatpush.bf16.msra.mxu0 %v4060_v42  ;;  %v4313_v42 = vld [vmem:[%s7429_s3 + $0x2b0] sm:$0xf0]  ;;  %v4862_v29 = vld [vmem:[%s7429_s3 + $0xcc] sm:$0xf] }
 0x10d   :  { %2611 = vmatpush.bf16.msra.mxu1 %v4188_v57  ;;  %v4316_v48 = vor.u32 %v4921_v38, %v4313_v42  ;;  %v4015_v42 = vld [vmem:[%s7429_s3 + $0x48] sm:$0xf] }
 0x10f   :  { %2624 = vmatpush.bf16.msra.mxu2 %v4316_v48  ;;  %v4848_v48 = vld [vmem:[%s7429_s3 + $0x54] sm:$0xf0] }
 0x110   :  { %2599 = vmatpush.bf16.msra.mxu0 %v4044_v52  ;;  %v1587_v57 = vpop.f32.mrf.mxu2  ;;  %v4959_v52 = vld [vmem:[%s7429_s3 + $0x3cc] sm:$0xf0]  ;;  %v4016_v54 = vor.u32 %v4848_v48, %v4015_v42 }
 0x111   :  { %2612 = vmatpush.bf16.msra.mxu1 %v4172_v56  ;;  %v1600_v25 = vpop.f32.mrf.mxu3  ;;  %v4456_v55 = vor.u32 %v4959_v52, %v4455_v9  ;;  %v4917_v56 = vld [vmem:[%s7429_s3 + $0x284] sm:$0xf]  ;;  %v4160_v57 = vor.u32 %v4884_v47, %v4159_v34  ;;  %v4880_v9 = vld [vmem:[%s7429_s3 + $0x154] sm:$0xf0]  ;;  %v4209_v34 = vld [vmem:[%s7429_s3 + $0x1d8] sm:$0xf0] }
 0x112   :  { %v4300_v58 = vor.u32 %v4917_v56, %v4297_v59  ;;  %v4901_v25 = vld [vmem:[%s7429_s3 + $0x204] sm:$0xf]  ;;  %v4144_v56 = vor.u32 %v4880_v9, %v4143_v51  ;;  %v3999_v59 = vld [vmem:[%s7429_s3 + $0x28] sm:$0xf]  ;;  %v4854_v9 = vld [vmem:[%s7429_s3 + $0x8c] sm:$0xf] }
 0x113   :  { %2584 = vmatpush.bf16.msrb.mxu3 %v4456_v55 }
 0x114   :  { %2600 = vmatpush.bf16.msra.mxu0 %v4028_v1  ;;  %v4208_v1 = vor.u32 %v4896_v60, %v4207_v49  ;;  %2625 = vmatpush.bf16.msra.mxu2 %v4300_v58  ;;  %v4844_v49 = vld [vmem:[%s7429_s3 + $0x34] sm:$0xf0]  ;;  %v4939_v60 = vld [vmem:[%s7429_s3 + $0x32c] sm:$0xf0] }
 0x115   :  { %2613 = vmatpush.bf16.msra.mxu1 %v4156_v5  ;;  %v4191_v5 = vld [vmem:[%s7429_s3 + $0x1a8] sm:$0xf] }
 0x117   :  { %2585 = vmatpush.bf16.msrb.mxu3 %v4440_v3  ;;  %v4000_v3 = vor.u32 %v4844_v49, %v3999_v59  ;;  %v4945_v59 = vld [vmem:[%s7429_s3 + $0x364] sm:$0xf]  ;;  %v4409_v49 = vld [vmem:[%s7429_s3 + $0x370] sm:$0xf0] }
 0x118   :  { %2601 = vmatpush.bf16.msra.mxu0 %v4012_v16  ;;  %v4192_v16 = vor.u32 %v4892_v6, %v4191_v5  ;;  %2626 = vmatpush.bf16.msra.mxu2 %v4284_v7  ;;  %v4111_v6 = vld [vmem:[%s7429_s3 + $0x108] sm:$0xf]  ;;  %v4360_v7 = vor.u32 %v4935_v23, %v4359_v4 }
 0x119   :  { %2614 = vmatpush.bf16.msra.mxu1 %v4140_v15  ;;  %v4424_v15 = vor.u32 %v4951_v11, %v4423_v10  ;;  %v4473_v10 = vld [vmem:[%s7429_s3 + $0x3f0] sm:$0xf0] }
 0x11b   :  { %2586 = vmatpush.bf16.msrb.mxu3 %v4424_v15  ;;  %v4898_v15 = vld [vmem:[%s7429_s3 + $0x1ec] sm:$0xf] }
 0x11c   :  { %2602 = vmatpush.bf16.msra.mxu0 %v3996_v27  ;;  %v4176_v27 = vor.u32 %v4888_v22, %v4175_v21  ;;  %2627 = vmatpush.bf16.msra.mxu2 %v4268_v36  ;;  %v4112_v36 = vor.u32 %v4872_v12, %v4111_v6  ;;  %v4393_v6 = vld [vmem:[%s7429_s3 + $0x350] sm:$0xf0] }
 0x11d   :  { %2615 = vmatpush.bf16.msra.mxu1 %v4124_v35  ;;  %v4249_v35 = vld [vmem:[%s7429_s3 + $0x230] sm:$0xf0] }
 0x11e   :  { %v4252_v39 = vor.u32 %v4905_v32, %v4249_v35  ;;  %v4460_v32 = vor.u32 %v4957_v26, %v4457_v33  ;;  %v4894_v35 = vld [vmem:[%s7429_s3 + $0x1cc] sm:$0xf] }
 0x11f   :  { %2587 = vmatpush.bf16.msrb.mxu3 %v4408_v30  ;;  %v4081_v30 = vld [vmem:[%s7429_s3 + $0xd8] sm:$0xf0]  ;;  %v4212_v42 = vor.u32 %v4894_v35, %v4209_v34 }
 0x120   :  { %2603 = vmatpush.bf16.msra.mxu0 %v3980_v43  ;;  %v6870_v38 = vpop.f32.mrf.mxu0  ;;  %2628 = vmatpush.bf16.msra.mxu2 %v4252_v39  ;;  %v4392_v43 = vor.u32 %v4943_v46, %v4391_v45  ;;  %v4084_v47 = vor.u32 %v4862_v29, %v4081_v30  ;;  %v4441_v39 = vld [vmem:[%s7429_s3 + $0x3b0] sm:$0xf0]  ;;  %v4858_v45 = vld [vmem:[%s7429_s3 + $0xac] sm:$0xf]  ;;  %v4065_v46 = vld [vmem:[%s7429_s3 + $0xb8] sm:$0xf0] }
 0x121   :  { %2616 = vmatpush.bf16.msra.mxu1 %v4108_v50  ;;  %v6872_v40 = vpop.f32.mrf.mxu1  ;;  %v4233_v50 = vld [vmem:[%s7429_s3 + $0x210] sm:$0xf0]  ;;  %v4874_v30 = vld [vmem:[%s7429_s3 + $0x12c] sm:$0xf] }
 0x122   :  { %v4236_v52 = vor.u32 %v4901_v25, %v4233_v50  ;;  %v4425_v25 = vld [vmem:[%s7429_s3 + $0x390] sm:$0xf0]  ;;  %v4068_v50 = vor.u32 %v4858_v45, %v4065_v46 }
 0x123   :  { %2604 = vmatmul.bf16.vlgmr.msra.gmra.mxu0 %v6628_v28  ;;  %2588 = vmatpush.bf16.msrb.mxu3 %v4392_v43  ;;  %v4949_v43 = vld [vmem:[%s7429_s3 + $0x384] sm:$0xf]  ;;  %v4361_v45 = vld [vmem:[%s7429_s3 + $0x310] sm:$0xf0] }
 0x124   :  { %2648 = vmatpush.bf16.msrb.mxu0 %v4096_v8  ;;  %2617 = vmatmul.bf16.vlgmr.msra.gmra.mxu1 %v6711_v17  ;;  %v268_v8 = vperm.slane %v6413_v24, 2  ;;  %v4375_v24 = vld [vmem:[%s7429_s3 + $0x320] sm:$0xf] }
 0x125   :  { %2661 = vmatpush.bf16.msrb.mxu1 %v4224_v53  ;;  %2629 = vmatpush.bf16.msra.mxu2 %v4236_v52  ;;  %v4376_v0 = vor.u32 %v4939_v60, %v4375_v24  ;;  %v4049_v52 = vld [vmem:[%s7429_s3 + $0x98] sm:$0xf0]  ;;  %v4886_v24 = vld [vmem:[%s7429_s3 + $0x18c] sm:$0xf] }
 0x126   :  { %v1586_v58 = vadd.f32 %v6713_v13, %v268_v8  ;;  %v4840_v13 = vld [vmem:[%s7429_s3 + $0x14] sm:$0xf0] }
 0x127   :  { %2589 = vmatpush.bf16.msrb.mxu3 %v4376_v0 }
 0x128   :  { %2649 = vmatpush.bf16.msrb.mxu0 %v4080_v61  ;;  %v6899_v53 = vpop.f32.mrf.mxu2  ;;  %v4127_v61 = vld [vmem:[%s7429_s3 + $0x128] sm:$0xf]  ;;  %v1613_v63 = vpop.f32.mrf.mxu0  ;;  %v1599_v11 = vadd.f32 %v6718_v19, %v1586_v58  ;;  %v4225_v19 = vld [vmem:[%s7429_s3 + $0x1f8] sm:$0xf0] }
 0x129   :  { %2662 = vmatpush.bf16.msrb.mxu1 %v4208_v1  ;;  %v6901_v55 = vpop.f32.mrf.mxu3  ;;  %v3983_v1 = vld [vmem:[%s7429_s3 + $0x8] sm:$0xf]  ;;  %v1626_v2 = vpop.f32.mrf.mxu1  ;;  %v4128_v5 = vor.u32 %v4876_v62, %v4127_v61  ;;  %v4850_v61 = vld [vmem:[%s7429_s3 + $0x6c] sm:$0xf]  ;;  %v4033_v62 = vld [vmem:[%s7429_s3 + $0x78] sm:$0xf0]  ;;  %v4412_v63 = vor.u32 %v4945_v59, %v4409_v49 }
 0x12a   :  { %v3984_v21 = vor.u32 %v4840_v13, %v3983_v1  ;;  %v1612_v44 = vadd.f32 %v6870_v38, %v1599_v11  ;;  %v4953_v38 = vld [vmem:[%s7429_s3 + $0x3a4] sm:$0xf]  ;;  %v4882_v1 = vld [vmem:[%s7429_s3 + $0x16c] sm:$0xf]  ;;  %v4932_v13 = vld [vmem:[%s7429_s3 + $0x2f4] sm:$0xf0]  ;;  %v4036_v4 = vor.u32 %v4850_v61, %v4033_v62 }
 0x12b   :  { %2590 = vmatpush.bf16.msrb.mxu3 %v4360_v7  ;;  %v4444_v48 = vor.u32 %v4953_v38, %v4441_v39  ;;  %v4017_v11 = vld [vmem:[%s7429_s3 + $0x58] sm:$0xf0]  ;;  %v4924_v38 = vld [vmem:[%s7429_s3 + $0x2b4] sm:$0xf0]  ;;  %v4287_v49 = vld [vmem:[%s7429_s3 + $0x268] sm:$0xf] }
 0x12c   :  { %2650 = vmatpush.bf16.msrb.mxu0 %v4064_v14  ;;  %v4961_v14 = vld [vmem:[%s7429_s3 + $0x3e4] sm:$0xf]  ;;  %v4271_v62 = vld [vmem:[%s7429_s3 + $0x248] sm:$0xf] }
 0x12d   :  { %2663 = vmatpush.bf16.msrb.mxu1 %v4192_v16  ;;  %v4866_v16 = vld [vmem:[%s7429_s3 + $0xec] sm:$0xf]  ;;  %v4476_v31 = vor.u32 %v4961_v14, %v4473_v10 }
 0x12e   :  { %v4846_v10 = vld [vmem:[%s7429_s3 + $0x4c] sm:$0xf] }
 0x12f   :  { %2635 = vmatpush.bf16.msra.mxu3 %v4476_v31 }
 0x130   :  { %2651 = vmatpush.bf16.msrb.mxu0 %v4048_v37  ;;  %v1639_v20 = vpop.f32.mrf.mxu2  ;;  %v4100_v37 = vor.u32 %v4866_v16, %v4097_v18  ;;  %v4878_v16 = vld [vmem:[%s7429_s3 + $0x14c] sm:$0xf]  ;;  %v4145_v18 = vld [vmem:[%s7429_s3 + $0x158] sm:$0xf0] }
 0x131   :  { %2664 = vmatpush.bf16.msrb.mxu1 %v4176_v27  ;;  %v1652_v22 = vpop.f32.mrf.mxu3  ;;  %v4228_v27 = vor.u32 %v4898_v15, %v4225_v19  ;;  %v4335_v19 = vld [vmem:[%s7429_s3 + $0x2c8] sm:$0xf]  ;;  %v4928_v20 = vld [vmem:[%s7429_s3 + $0x2d4] sm:$0xf0] }
 0x132   :  { %v4937_v22 = vld [vmem:[%s7429_s3 + $0x324] sm:$0xf]  ;;  %v4336_v29 = vor.u32 %v4928_v20, %v4335_v19 }
 0x133   :  { %2636 = vmatpush.bf16.msra.mxu3 %v4460_v32  ;;  %v4129_v32 = vld [vmem:[%s7429_s3 + $0x138] sm:$0xf0] }
 0x134   :  { %2652 = vmatpush.bf16.msrb.mxu0 %v4032_v41  ;;  %v1625_v41 = vadd.f32 %v6872_v40, %v1612_v44  ;;  %v4193_v40 = vld [vmem:[%s7429_s3 + $0x1b8] sm:$0xf0]  ;;  %v4842_v44 = vld [vmem:[%s7429_s3 + $0x2c] sm:$0xf]  ;;  %v4132_v46 = vor.u32 %v4874_v30, %v4129_v32 }
 0x135   :  { %2665 = vmatpush.bf16.msrb.mxu1 %v4160_v57  ;;  %v4890_v57 = vld [vmem:[%s7429_s3 + $0x1ac] sm:$0xf] }
 0x136   :  { %v1638_v8 = vadd.f32 %v6899_v53, %v1625_v41  ;;  %v4196_v51 = vor.u32 %v4890_v57, %v4193_v40  ;;  %v4177_v53 = vld [vmem:[%s7429_s3 + $0x198] sm:$0xf0]  ;;  %v4838_v57 = vld [vmem:[%s7429_s3 + $0xc] sm:$0xf] }
 0x137   :  { %2637 = vmatpush.bf16.msra.mxu3 %v4444_v48  ;;  %v4180_v58 = vor.u32 %v4886_v24, %v4177_v53  ;;  %v3985_v48 = vld [vmem:[%s7429_s3 + $0x18] sm:$0xf0]  ;;  %v4918_v32 = vld [vmem:[%s7429_s3 + $0x28c] sm:$0xf] }
 0x138   :  { %2653 = vmatpush.bf16.msrb.mxu0 %v4016_v54  ;;  %v4428_v54 = vor.u32 %v4949_v43, %v4425_v25  ;;  %v1651_v60 = vadd.f32 %v6901_v55, %v1638_v8  ;;  %v4161_v55 = vld [vmem:[%s7429_s3 + $0x178] sm:$0xf0]  ;;  %v4870_v43 = vld [vmem:[%s7429_s3 + $0x10c] sm:$0xf]  ;;  %v4303_v8 = vld [vmem:[%s7429_s3 + $0x288] sm:$0xf] }
 0x139   :  { %2666 = vmatpush.bf16.msrb.mxu1 %v4144_v56  ;;  %v4052_v56 = vor.u32 %v4854_v9, %v4049_v52  ;;  %v4164_v14 = vor.u32 %v4882_v1, %v4161_v55  ;;  %v4113_v25 = vld [vmem:[%s7429_s3 + $0x118] sm:$0xf0]  ;;  %v3988_v9 = vor.u32 %v4838_v57, %v3985_v48  ;;  %v4255_v55 = vld [vmem:[%s7429_s3 + $0x228] sm:$0xf] }
 0x13a   :  { %v4116_v52 = vor.u32 %v4870_v43, %v4113_v25  ;;  %v4289_v57 = vld [vmem:[%s7429_s3 + $0x278] sm:$0xf0]  ;;  %v4447_v48 = vld [vmem:[%s7429_s3 + $0x3a8] sm:$0xf] }
 0x13b   :  { %2638 = vmatpush.bf16.msra.mxu3 %v4428_v54 }
 0x13c   :  { %2654 = vmatpush.bf16.msrb.mxu0 %v4000_v3  ;;  %v4351_v3 = vld [vmem:[%s7429_s3 + $0x2e8] sm:$0xf] }
 0x13d   :  { %2667 = vmatpush.bf16.msrb.mxu1 %v4128_v5  ;;  %v4941_v5 = vld [vmem:[%s7429_s3 + $0x344] sm:$0xf]  ;;  %v4352_v12 = vor.u32 %v4932_v13, %v4351_v3 }
 0x13e   :  { %v4396_v31 = vor.u32 %v4941_v5, %v4393_v6  ;;  %v4930_v5 = vld [vmem:[%s7429_s3 + $0x2ec] sm:$0xf]  ;;  %v4353_v6 = vld [vmem:[%s7429_s3 + $0x2f8] sm:$0xf0] }
 0x13f   :  { %2639 = vmatpush.bf16.msra.mxu3 %v4412_v63  ;;  %v4912_v63 = vld [vmem:[%s7429_s3 + $0x254] sm:$0xf0] }
 0x140   :  { %2655 = vmatpush.bf16.msrb.mxu0 %v3984_v21  ;;  %v1663_v0 = vpop.f32.mrf.mxu0  ;;  %v4020_v21 = vor.u32 %v4846_v10, %v4017_v11  ;;  %v4356_v10 = vor.u32 %v4930_v5, %v4353_v6  ;;  %v4926_v11 = vld [vmem:[%s7429_s3 + $0x2cc] sm:$0xf]  ;;  %v4481_v6 = vld [vmem:[%s7429_s3 + $0x3f8] sm:$0xf0] }
 0x141   :  { %2668 = vmatpush.bf16.msrb.mxu1 %v4112_v36  ;;  %v1664_v2 = vadd.f32 %v1663_v0, %v1651_v60  ;;  %v7043_v23 = vpop.f32.mrf.mxu1  ;;  %v4377_v36 = vld [vmem:[%s7429_s3 + $0x330] sm:$0xf0]  ;;  %v4916_v60 = vld [vmem:[%s7429_s3 + $0x274] sm:$0xf0]  ;;  %v4272_v0 = vor.u32 %v4912_v63, %v4271_v62  ;;  %v4399_v63 = vld [vmem:[%s7429_s3 + $0x348] sm:$0xf] }
 0x142   :  { %v4380_v34 = vor.u32 %v4937_v22, %v4377_v36  ;;  %v4922_v36 = vld [vmem:[%s7429_s3 + $0x2ac] sm:$0xf] }
 0x143   :  { %2656 = vmatmul.bf16.vlgmr.msrb.gmra.mxu0 %v6628_v28  ;;  %v1760_v7 = vmax.f32 %v1664_v2, 0.0  ;;  %2640 = vmatpush.bf16.msra.mxu3 %v4396_v31  ;;  %v4962_v5 = vld [vmem:[%s7429_s3 + $0x3ec] sm:$0xf] }
 0x144   :  { %2700 = vmatpush.bf16.msra.mxu0 %v4100_v37  ;;  %2669 = vmatmul.bf16.vlgmr.msrb.gmra.mxu1 %v6711_v17  ;;  %v4148_v37 = vor.u32 %v4878_v16, %v4145_v18 }
 0x145   :  { %2713 = vmatpush.bf16.msra.mxu1 %v4228_v27  ;;  %v7063_v15 = vpack.c.bf16 %v1760_v7, %v1760_v7  ;;  %v4001_v27 = vld [vmem:[%s7429_s3 + $0x38] sm:$0xf0] }
 0x146   :  { %v4004_v39 = vor.u32 %v4842_v44, %v4001_v27  ;;  %v4964_v44 = vld [vmem:[%s7429_s3 + $0x3f4] sm:$0xf0] }
 0x147   :  { %2578 = vmatmul.bf16.vlgmr.msrb.gmra.mxu2 %v7063_v15  ;;  %2641 = vmatpush.bf16.msra.mxu3 %v4380_v34 }
 0x148   :  { %2701 = vmatpush.bf16.msra.mxu0 %v4084_v47  ;;  %v1689_v26 = vpop.f32.mrf.mxu2  ;;  %2674 = vmatpush.bf16.msrb.mxu2 %v4352_v12  ;;  %v1665_v35 = vpop.f32.mrf.mxu0  ;;  %v4319_v47 = vld [vmem:[%s7429_s3 + $0x2a8] sm:$0xf]  ;;  %v4337_v12 = vld [vmem:[%s7429_s3 + $0x2d8] sm:$0xf0] }
 0x149   :  { %2714 = vmatpush.bf16.msra.mxu1 %v4212_v42  ;;  %v1702_v33 = vpop.f32.mrf.mxu3  ;;  %v1678_v41 = vpop.f32.mrf.mxu1  ;;  %v4933_v42 = vld [vmem:[%s7429_s3 + $0x304] sm:$0xf]  ;;  %v4320_v40 = vor.u32 %v4924_v38, %v4319_v47  ;;  %v4305_v35 = vld [vmem:[%s7429_s3 + $0x298] sm:$0xf0]  ;;  %v4463_v47 = vld [vmem:[%s7429_s3 + $0x3c8] sm:$0xf] }
 0x14a   :  { %v4960_v38 = vld [vmem:[%s7429_s3 + $0x3d4] sm:$0xf0] }
 0x14c   :  { %2702 = vmatpush.bf16.msra.mxu0 %v4068_v50  ;;  %2675 = vmatpush.bf16.msrb.mxu2 %v4336_v29  ;;  %v4364_v50 = vor.u32 %v4933_v42, %v4361_v45  ;;  %v4308_v42 = vor.u32 %v4918_v32, %v4305_v35  ;;  %v4464_v45 = vor.u32 %v4960_v38, %v4463_v47  ;;  %v4942_v32 = vld [vmem:[%s7429_s3 + $0x34c] sm:$0xf]  ;;  %v4401_v35 = vld [vmem:[%s7429_s3 + $0x358] sm:$0xf0] }
 0x14d   :  { %2715 = vmatpush.bf16.msra.mxu1 %v4196_v51  ;;  %v4920_v51 = vld [vmem:[%s7429_s3 + $0x294] sm:$0xf0]  ;;  %v4404_v38 = vor.u32 %v4942_v32, %v4401_v35 }
 0x14e   :  { %v4304_v53 = vor.u32 %v4920_v51, %v4303_v8  ;;  %2642 = vmatpush.bf16.msra.mxu3 %v4364_v50  ;;  %v4910_v50 = vld [vmem:[%s7429_s3 + $0x24c] sm:$0xf]  ;;  %v4273_v8 = vld [vmem:[%s7429_s3 + $0x258] sm:$0xf0]  ;;  %v4431_v51 = vld [vmem:[%s7429_s3 + $0x388] sm:$0xf] }
 0x150   :  { %2703 = vmatpush.bf16.msra.mxu0 %v4052_v56  ;;  %v1691_v54 = vpop.f32.mrf.mxu2  ;;  %2676 = vmatpush.bf16.msrb.mxu2 %v4320_v40  ;;  %v4998_v56 = vld [vmem:[%s7428_s2] sm:$0xf]  ;;  %v4956_v40 = vld [vmem:[%s7429_s3 + $0x3b4] sm:$0xf0] }
 0x151   :  { %2716 = vmatpush.bf16.msra.mxu1 %v4180_v58  ;;  %v1704_v24 = vpop.f32.mrf.mxu3  ;;  %v269_v59 = vperm.slane %v4998_v56, 3  ;;  %v4288_v58 = vor.u32 %v4916_v60, %v4287_v49  ;;  %v4448_v25 = vor.u32 %v4956_v40, %v4447_v48  ;;  %v4415_v56 = vld [vmem:[%s7429_s3 + $0x368] sm:$0xf]  ;;  %v4934_v48 = vld [vmem:[%s7429_s3 + $0x30c] sm:$0xf] }
 0x152   :  { %v4906_v24 = vld [vmem:[%s7429_s3 + $0x22c] sm:$0xf]  ;;  %v4369_v40 = vld [vmem:[%s7429_s3 + $0x318] sm:$0xf0] }
 0x153   :  { %v1677_v61 = vadd.f32 %v7043_v23, %v269_v59  ;;  %v4948_v59 = vld [vmem:[%s7429_s3 + $0x374] sm:$0xf0] }
 0x154   :  { %2704 = vmatpush.bf16.msra.mxu0 %v4036_v4  ;;  %2677 = vmatpush.bf16.msrb.mxu2 %v4304_v53  ;;  %v4904_v4 = vld [vmem:[%s7429_s3 + $0x214] sm:$0xf0]  ;;  %v4257_v53 = vld [vmem:[%s7429_s3 + $0x238] sm:$0xf0]  ;;  %v4416_v60 = vor.u32 %v4948_v59, %v4415_v56  ;;  %v4969_v59 = vld [vmem:[%s7431_s5 + $0x20] sm:$0xff] }
 0x155   :  { %2717 = vmatpush.bf16.msra.mxu1 %v4164_v14  ;;  %v1690_v1 = vadd.f32 %v1689_v26, %v1677_v61  ;;  %v4260_v49 = vor.u32 %v4906_v24, %v4257_v53  ;;  %v4241_v61 = vld [vmem:[%s7429_s3 + $0x218] sm:$0xf0]  ;;  %v4971_v24 = vld [vmem:[%s7431_s5 + $0x30] sm:$0xff] }
 0x157   :  { %2630 = vmatmul.bf16.vlgmr.msra.gmra.mxu2 %v7063_v15  ;;  %v1703_v3 = vadd.f32 %v1702_v33, %v1690_v1  ;;  %v4479_v33 = vld [vmem:[%s7429_s3 + $0x3e8] sm:$0xf] }
 0x158   :  { %2705 = vmatpush.bf16.msra.mxu0 %v4020_v21  ;;  %2678 = vmatpush.bf16.msrb.mxu2 %v4288_v58  ;;  %v4340_v21 = vor.u32 %v4926_v11, %v4337_v12  ;;  %v4480_v30 = vor.u32 %v4964_v44, %v4479_v33  ;;  %v4902_v58 = vld [vmem:[%s7429_s3 + $0x20c] sm:$0xf]  ;;  %v4417_v44 = vld [vmem:[%s7429_s3 + $0x378] sm:$0xf0] }
 0x159   :  { %2718 = vmatpush.bf16.msra.mxu1 %v4148_v37  ;;  %v4321_v37 = vld [vmem:[%s7429_s3 + $0x2b8] sm:$0xf0]  ;;  %v4244_v1 = vor.u32 %v4902_v58, %v4241_v61  ;;  %v4958_v11 = vld [vmem:[%s7429_s3 + $0x3cc] sm:$0xf]  ;;  %v4967_v61 = vld [vmem:[%s7431_s5 + $0x10] sm:$0xff] }
 0x15a   :  { %v4324_v29 = vor.u32 %v4922_v36, %v4321_v37  ;;  %v4433_v36 = vld [vmem:[%s7429_s3 + $0x398] sm:$0xf0]  ;;  %v4946_v33 = vld [vmem:[%s7429_s3 + $0x36c] sm:$0xf] }
 0x15c   :  { %2706 = vmatpush.bf16.msra.mxu0 %v4004_v39  ;;  %2679 = vmatpush.bf16.msrb.mxu2 %v4272_v0  ;;  %v4944_v0 = vld [vmem:[%s7429_s3 + $0x354] sm:$0xf0] }
 0x15d   :  { %2719 = vmatpush.bf16.msra.mxu1 %v4132_v46  ;;  %v4914_v46 = vld [vmem:[%s7429_s3 + $0x26c] sm:$0xf] }
 0x15e   :  { %v4292_v43 = vor.u32 %v4914_v46, %v4289_v57 }
 0x160   :  { %2707 = vmatpush.bf16.msra.mxu0 %v3988_v9  ;;  %v1715_v13 = vpop.f32.mrf.mxu0  ;;  %v4952_v9 = vld [vmem:[%s7429_s3 + $0x394] sm:$0xf0] }
 0x161   :  { %2720 = vmatpush.bf16.msra.mxu1 %v4116_v52  ;;  %v1728_v23 = vpop.f32.mrf.mxu1  ;;  %v1716_v7 = vadd.f32 %v1715_v13, %v1703_v3  ;;  %v4276_v52 = vor.u32 %v4910_v50, %v4273_v8  ;;  %v4432_v54 = vor.u32 %v4952_v9, %v4431_v51  ;;  %v7249_v13 = vld [vmem:[%s7430_s4] sm:$0xf]  ;;  %v4972_v51 = vld [vmem:[%s7431_s5 + $0x38] sm:$0xff] }
 0x162   :  { %v1898_v50 = vperm.slane %v7249_v13, 2 }
 0x163   :  { %2708 = vmatmul.bf16.vlgmr.msra.gmra.mxu0 %v6628_v28  ;;  %v4908_v28 = vld [vmem:[%s7429_s3 + $0x234] sm:$0xf0]  ;;  %v1729_v16 = vadd.f32 %v1728_v23, %v1716_v7  ;;  %v1896_v7 = vperm.slane %v7249_v13, 0 }
 0x164   :  { %2721 = vmatmul.bf16.vlgmr.msra.gmra.mxu1 %v6711_v17  ;;  %v4256_v2 = vor.u32 %v4908_v28, %v4255_v55  ;;  %v4239_v17 = vld [vmem:[%s7429_s3 + $0x208] sm:$0xf]  ;;  %v4400_v55 = vor.u32 %v4944_v0, %v4399_v63  ;;  %v4936_v23 = vld [vmem:[%s7429_s3 + $0x314] sm:$0xf0]  ;;  %3020 = vmatpush.bf16.msrb.mxu0 %v4972_v51  ;;  %v1899_v63 = vperm.slane %v7249_v13, 3  ;;  %v4989_v51 = vld [vmem:[%s7431_s5 + $0xc0] sm:$0xff] }
 0x165   :  { %v4240_v14 = vor.u32 %v4904_v4, %v4239_v17  ;;  %v4383_v28 = vld [vmem:[%s7429_s3 + $0x328] sm:$0xf] }
 0x166   :  { %2680 = vmatpush.bf16.msrb.mxu2 %v4256_v2  ;;  %v4940_v2 = vld [vmem:[%s7429_s3 + $0x334] sm:$0xf0]  ;;  %v4367_v4 = vld [vmem:[%s7429_s3 + $0x308] sm:$0xf] }
 0x167   :  { %v4384_v3 = vor.u32 %v4940_v2, %v4383_v28  ;;  %v4966_v0 = vld [vmem:[%s7431_s5 + $0x8] sm:$0xff] }
 0x168   :  { %v1741_v18 = vpop.f32.mrf.mxu2  ;;  %v1717_v20 = vpop.f32.mrf.mxu0  ;;  %3021 = vmatpush.bf16.msrb.mxu0 %v4971_v24 }
 0x169   :  { %v1742_v31 = vadd.f32 %v1741_v18, %v1729_v16  ;;  %v1754_v19 = vpop.f32.mrf.mxu3  ;;  %v1730_v22 = vpop.f32.mrf.mxu1  ;;  %v4449_v20 = vld [vmem:[%s7429_s3 + $0x3b8] sm:$0xf0] }
 0x16a   :  { %2681 = vmatpush.bf16.msrb.mxu2 %v4240_v14  ;;  %v4368_v14 = vor.u32 %v4936_v23, %v4367_v4  ;;  %v4950_v22 = vld [vmem:[%s7429_s3 + $0x38c] sm:$0xf]  ;;  %v4976_v23 = vld [vmem:[%s7431_s5 + $0x58] sm:$0xff] }
 0x16b   :  { %v1755_v26 = vadd.f32 %v1754_v19, %v1742_v31  ;;  %v4954_v19 = vld [vmem:[%s7429_s3 + $0x3ac] sm:$0xf] }
 0x16d   :  { %2682 = vmatmul.bf16.vlgmr.msrb.gmra.mxu2 %v7063_v15  ;;  %v1761_v27 = vmax.f32 %v1755_v26, 0.0  ;;  %v4436_v26 = vor.u32 %v4950_v22, %v4433_v36 }
 0x16e   :  { %2726 = vmatpush.bf16.msra.mxu2 %v4356_v10  ;;  %v4484_v10 = vor.u32 %v4962_v5, %v4481_v6  ;;  %v4988_v5 = vld [vmem:[%s7431_s5 + $0xb8] sm:$0xff]  ;;  %v4975_v6 = vld [vmem:[%s7431_s5 + $0x50] sm:$0xff] }
 0x16f   :  { %v7182_v34 = vpack.c.bf16 %v1761_v27, %v1761_v27  ;;  %v1897_v27 = vperm.slane %v7249_v13, 1  ;;  %v4977_v13 = vld [vmem:[%s7431_s5 + $0x60] sm:$0xff] }
 0x170   :  { %v1743_v39 = vpop.f32.mrf.mxu2 }
 0x171   :  { %v1756_v41 = vpop.f32.mrf.mxu3  ;;  %2591 = vmatmul.bf16.vlgmr.msrb.gmra.mxu3 %v7182_v34 }
 0x172   :  { %2727 = vmatpush.bf16.msra.mxu2 %v4340_v21  ;;  %2687 = vmatpush.bf16.msrb.mxu3 %v4480_v30  ;;  %v4452_v21 = vor.u32 %v4954_v19, %v4449_v20  ;;  %v4938_v41 = vld [vmem:[%s7429_s3 + $0x32c] sm:$0xf]  ;;  %v4985_v19 = vld [vmem:[%s7431_s5 + $0xa0] sm:$0xff]  ;;  %v4984_v20 = vld [vmem:[%s7431_s5 + $0x98] sm:$0xff] }
 0x176   :  { %2728 = vmatpush.bf16.msra.mxu2 %v4324_v29  ;;  %2688 = vmatpush.bf16.msrb.mxu3 %v4464_v45  ;;  %v4420_v29 = vor.u32 %v4946_v33, %v4417_v44 }
 0x17a   :  { %2729 = vmatpush.bf16.msra.mxu2 %v4308_v42  ;;  %2689 = vmatpush.bf16.msrb.mxu3 %v4448_v25  ;;  %v4385_v42 = vld [vmem:[%s7429_s3 + $0x338] sm:$0xf0] }
 0x17b   :  { %v4388_v46 = vor.u32 %v4938_v41, %v4385_v42 }
 0x17e   :  { %2730 = vmatpush.bf16.msra.mxu2 %v4292_v43  ;;  %2690 = vmatpush.bf16.msrb.mxu3 %v4432_v54  ;;  %v4372_v43 = vor.u32 %v4934_v48, %v4369_v40  ;;  %v4991_v40 = vld [vmem:[%s7431_s5 + $0xd0] sm:$0xff] }
 0x180   :  { %v2553_v62 = vpop.f32.mrf.mxu0 }
 0x181   :  { %2643 = vmatmul.bf16.vlgmr.msra.gmra.mxu3 %v7182_v34  ;;  %v2554_v12 = vadd.f32 %v2553_v62, %v1896_v7  ;;  %v4979_v62 = vld [vmem:[%s7431_s5 + $0x70] sm:$0xff] }
 0x182   :  { %2731 = vmatpush.bf16.msra.mxu2 %v4276_v52  ;;  %2691 = vmatpush.bf16.msrb.mxu3 %v4416_v60  ;;  %v4968_v60 = vld [vmem:[%s7431_s5 + $0x18] sm:$0xff]  ;;  %v4987_v7 = vld [vmem:[%s7431_s5 + $0xb0] sm:$0xff] }
 0x186   :  { %2732 = vmatpush.bf16.msra.mxu2 %v4260_v49  ;;  %2692 = vmatpush.bf16.msrb.mxu3 %v4400_v55  ;;  %v4980_v49 = vld [vmem:[%s7431_s5 + $0x78] sm:$0xff] }
 0x187   :  { %v2566_v16 = vpop.f32.mrf.mxu1  ;;  %3033 = vmatpush.bf16.msrb.mxu1 %v4980_v49 }
 0x188   :  { %v2555_v17 = vpop.f32.mrf.mxu0  ;;  %v7271_v31 = vadd.f32 %v2566_v16, %v2554_v12  ;;  %v4986_v12 = vld [vmem:[%s7431_s5 + $0xa8] sm:$0xff] }
 0x189   :  { %v4965_v17 = vld [vmem:[%s7431_s5] sm:$0xff] }
 0x18a   :  { %2733 = vmatpush.bf16.msra.mxu2 %v4244_v1  ;;  %2693 = vmatpush.bf16.msrb.mxu3 %v4384_v3  ;;  %v4978_v1 = vld [vmem:[%s7431_s5 + $0x68] sm:$0xff] }
 0x18b   :  { %3034 = vmatpush.bf16.msrb.mxu1 %v4979_v62 }
 0x18d   :  { %2734 = vmatmul.bf16.vlgmr.msra.gmra.mxu2 %v7063_v15  ;;  %v4465_v15 = vld [vmem:[%s7429_s3 + $0x3d8] sm:$0xf0] }
 0x18e   :  { %2694 = vmatpush.bf16.msrb.mxu3 %v4368_v14  ;;  %v4468_v18 = vor.u32 %v4958_v11, %v4465_v15  ;;  %3046 = vmatpush.bf16.msrb.mxu2 %v4988_v5  ;;  %v4974_v15 = vld [vmem:[%s7431_s5 + $0x48] sm:$0xff] }
 0x18f   :  { %v2568_v37 = vpop.f32.mrf.mxu1  ;;  %3035 = vmatpush.bf16.msrb.mxu1 %v4978_v1 }
 0x190   :  { %v4982_v37 = vld [vmem:[%s7431_s5 + $0x88] sm:$0xff] }
 0x191   :  { %2695 = vmatmul.bf16.vlgmr.msrb.gmra.mxu3 %v7182_v34 }
 0x192   :  { %2739 = vmatpush.bf16.msra.mxu3 %v4484_v10  ;;  %3047 = vmatpush.bf16.msrb.mxu2 %v4987_v7 }
 0x193   :  { %3036 = vmatpush.bf16.msrb.mxu1 %v4977_v13 }
 0x196   :  { %2740 = vmatpush.bf16.msra.mxu3 %v4468_v18  ;;  %3048 = vmatpush.bf16.msrb.mxu2 %v4986_v12  ;;  %v4973_v18 = vld [vmem:[%s7431_s5 + $0x40] sm:$0xff] }
 0x197   :  { %3037 = vmatpush.bf16.msrb.mxu1 %v4976_v23 }
 0x19a   :  { %2741 = vmatpush.bf16.msra.mxu3 %v4452_v21  ;;  %3049 = vmatpush.bf16.msrb.mxu2 %v4985_v19  ;;  %v4983_v21 = vld [vmem:[%s7431_s5 + $0x90] sm:$0xff] }
 0x19b   :  { %3038 = vmatpush.bf16.msrb.mxu1 %v4975_v6 }
 0x19e   :  { %2742 = vmatpush.bf16.msra.mxu3 %v4436_v26  ;;  %3050 = vmatpush.bf16.msrb.mxu2 %v4984_v20 }
 0x19f   :  { %3039 = vmatpush.bf16.msrb.mxu1 %v4974_v15 }
 0x1a0   :  { %v2605_v30 = vpop.f32.mrf.mxu0 }
 0x1a1   :  { %v2606_v47 = vadd.f32 %v2605_v30, %v1897_v27  ;;  %v2618_v39 = vpop.f32.mrf.mxu1  ;;  %v4996_v30 = vld [vmem:[%s7431_s5 + $0xf8] sm:$0xff] }
 0x1a2   :  { %2743 = vmatpush.bf16.msra.mxu3 %v4420_v29  ;;  %3051 = vmatpush.bf16.msrb.mxu2 %v4983_v21  ;;  %v4981_v29 = vld [vmem:[%s7431_s5 + $0x80] sm:$0xff] }
 0x1a3   :  { %v7305_v45 = vadd.f32 %v2618_v39, %v2606_v47  ;;  %3040 = vmatpush.bf16.msrb.mxu1 %v4973_v18  ;;  %v4994_v47 = vld [vmem:[%s7431_s5 + $0xe8] sm:$0xff] }
 0x1a6   :  { %2744 = vmatpush.bf16.msra.mxu3 %v4404_v38  ;;  %3052 = vmatpush.bf16.msrb.mxu2 %v4982_v37  ;;  %v4993_v38 = vld [vmem:[%s7431_s5 + $0xe0] sm:$0xff] }
 0x1a8   :  { %v2607_v57 = vpop.f32.mrf.mxu0 }
 0x1a9   :  { %v2620_v25 = vpop.f32.mrf.mxu1 }
 0x1aa   :  { %2745 = vmatpush.bf16.msra.mxu3 %v4388_v46  ;;  %3053 = vmatpush.bf16.msrb.mxu2 %v4981_v29  ;;  %v4992_v46 = vld [vmem:[%s7431_s5 + $0xd8] sm:$0xff] }
 0x1ae   :  { %2746 = vmatpush.bf16.msra.mxu3 %v4372_v43 }
 0x1b1   :  { %2747 = vmatmul.bf16.vlgmr.msra.gmra.mxu3 %v7182_v34  ;;  %v4970_v34 = vld [vmem:[%s7431_s5 + $0x28] sm:$0xff] }
 0x1b2   :  { %3022 = vmatpush.bf16.msrb.mxu0 %v4970_v34  ;;  %3059 = vmatpush.bf16.msrb.mxu3 %v4996_v30 }
 0x1b6   :  { %3023 = vmatpush.bf16.msrb.mxu0 %v4969_v59 }
 0x1ba   :  { %3024 = vmatpush.bf16.msrb.mxu0 %v4968_v60 }
 0x1be   :  { %3025 = vmatpush.bf16.msrb.mxu0 %v4967_v61 }
 0x1c0   :  { %v2657_v8 = vpop.f32.mrf.mxu0 }
 0x1c1   :  { %v2658_v9 = vadd.f32 %v2657_v8, %v1898_v50  ;;  %v2670_v52 = vpop.f32.mrf.mxu1 }
 0x1c2   :  { %3026 = vmatpush.bf16.msrb.mxu0 %v4966_v0 }
 0x1c3   :  { %v7318_v54 = vadd.f32 %v2670_v52, %v2658_v9 }
 0x1c6   :  { %3027 = vmatpush.bf16.msrb.mxu0 %v4965_v17 }
 0x1c8   :  { %v2659_v53 = vpop.f32.mrf.mxu0 }
 0x1c9   :  { %v2672_v56 = vpop.f32.mrf.mxu1 }
 0x1ca   :  { %v2579_v58 = vpop.f32.mrf.mxu2 }
 0x1cb   :  { %v2580_v36 = vadd.f32 %v2579_v58, %v7271_v31  ;;  %v4995_v31 = vld [vmem:[%s7431_s5 + $0xf0] sm:$0xff] }
 0x1cc   :  { %3060 = vmatpush.bf16.msrb.mxu3 %v4995_v31 }
 0x1d0   :  { %3061 = vmatpush.bf16.msrb.mxu3 %v4994_v47 }
 0x1d2   :  { %v2581_v28 = vpop.f32.mrf.mxu2 }
 0x1d3   :  { %v4997_v28 = vld [vmem:[%s7432_s6] ss:$0 sm:$0xff] }
 0x1d4   :  { %3062 = vmatpush.bf16.msrb.mxu3 %v4993_v38 }
 0x1d8   :  { %3063 = vmatpush.bf16.msrb.mxu3 %v4992_v46 }
 0x1da   :  { %v2631_v10 = vpop.f32.mrf.mxu2 }
 0x1db   :  { %v2632_v39 = vadd.f32 %v2631_v10, %v7305_v45  ;;  %v4990_v45 = vld [vmem:[%s7431_s5 + $0xc8] sm:$0xff] }
 0x1dc   :  { %3064 = vmatpush.bf16.msrb.mxu3 %v4991_v40 }
 0x1e0   :  { %v2709_v55 = vpop.f32.mrf.mxu0  ;;  %3065 = vmatpush.bf16.msrb.mxu3 %v4990_v45 }
 0x1e1   :  { %v2710_v2 = vadd.f32 %v2709_v55, %v1899_v63  ;;  %v2722_v3 = vpop.f32.mrf.mxu1 }
 0x1e2   :  { %v2633_v16 = vpop.f32.mrf.mxu2 }
 0x1e3   :  { %v7354_v4 = vadd.f32 %v2722_v3, %v2710_v2 }
 0x1e4   :  { %3066 = vmatpush.bf16.msrb.mxu3 %v4989_v51 }
 0x1e8   :  { %v2711_v14 = vpop.f32.mrf.mxu0 }
 0x1e9   :  { %v2724_v11 = vpop.f32.mrf.mxu1 }
 0x1f0   :  { %v2683_v22 = vpop.f32.mrf.mxu2 }
 0x1f1   :  { %v2684_v50 = vadd.f32 %v2683_v22, %v7318_v54 }
 0x1f4   :  { %v2592_v26 = vpop.f32.mrf.mxu3 }
 0x1f5   :  { %v2593_v33 = vadd.f32 %v2592_v26, %v2580_v36 }
 0x1f7   :  { %v2752_v27 = vmax.f32 %v2593_v33, 0.0 }
 0x1f8   :  { %v2685_v44 = vpop.f32.mrf.mxu2 }
 0x1f9   :  { %v2756_v32 = vpack.c.bf16 %v2752_v27, %v2752_v27 }
 0x1fb   :  { %3028 = vmatmul.bf16.vlgmr.msrb.gmra.mxu0 %v2756_v32 }
 0x1fc   :  { %v2594_v35 = vpop.f32.mrf.mxu3 }
 0x204   :  { %v2644_v41 = vpop.f32.mrf.mxu3 }
 0x205   :  { %v2645_v42 = vadd.f32 %v2644_v41, %v2632_v39 }
 0x207   :  { %v2753_v57 = vmax.f32 %v2645_v42, 0.0 }
 0x209   :  { %v2757_v48 = vpack.c.bf16 %v2753_v57, %v2753_v57 }
 0x20b   :  { %3041 = vmatmul.bf16.vlgmr.msrb.gmra.mxu1 %v2757_v48 }
 0x20c   :  { %v2646_v25 = vpop.f32.mrf.mxu3 }
 0x210   :  { %v2735_v43 = vpop.f32.mrf.mxu2 }
 0x211   :  { %v2736_v56 = vadd.f32 %v2735_v43, %v7354_v4 }
 0x214   :  { %v2696_v9 = vpop.f32.mrf.mxu3 }
 0x215   :  { %v2697_v52 = vadd.f32 %v2696_v9, %v2684_v50 }
 0x217   :  { %v2754_v24 = vmax.f32 %v2697_v52, 0.0 }
 0x218   :  { %v2737_v8 = vpop.f32.mrf.mxu2 }
 0x219   :  { %v2758_v53 = vpack.c.bf16 %v2754_v24, %v2754_v24 }
 0x21b   :  { %3054 = vmatmul.bf16.vlgmr.msrb.gmra.mxu2 %v2758_v53 }
 0x21c   :  { %v2698_v34 = vpop.f32.mrf.mxu3 }
 0x234   :  { %v2748_v59 = vpop.f32.mrf.mxu3 }
 0x235   :  { %v2749_v49 = vadd.f32 %v2748_v59, %v2736_v56 }
 0x237   :  { %v2755_v60 = vmax.f32 %v2749_v49, 0.0 }
 0x239   :  { %v2759_v58 = vpack.c.bf16 %v2755_v60, %v2755_v60 }
 0x23b   :  { %3067 = vmatmul.bf16.vlgmr.msrb.gmra.mxu3 %v2759_v58 }
 0x23c   :  { %v2750_v54 = vpop.f32.mrf.mxu3 }
 0x278   :  { %v3029_v61 = vpop.f32.mrf.mxu0 }
 0x279   :  { %v3030_v2 = vadd.f32 %v4997_v28, %v3029_v61 }
 0x280   :  { %v3031_v62 = vpop.f32.mrf.mxu0 }
 0x288   :  { %v3042_v63 = vpop.f32.mrf.mxu1 }
 0x289   :  { %v3043_v3 = vadd.f32 %v3042_v63, %v3030_v2 }
 0x290   :  { %v3044_v0 = vpop.f32.mrf.mxu1 }
 0x29e   :  { %v3055_v1 = vpop.f32.mrf.mxu2 }
 0x29f   :  { %v3056_v17 = vadd.f32 %v3055_v1, %v3043_v3 }
 0x2a6   :  { %v3057_v55 = vpop.f32.mrf.mxu2 }
 0x2be   :  { %v3068_v13 = vpop.f32.mrf.mxu3 }
 0x2bf   :  { %v3069_v4 = vadd.f32 %v3068_v13, %v3056_v17 }
 0x2c1   :  { %3072 = vst [vmem:[%s7433_s7] sm:$0xff] %v3069_v4 }
 0x2c6   :  { %v3070_v23 = vpop.f32.mrf.mxu3 }

</bundles_post_ra>
